<compile_context>
chip_gen: v5e
topology: v5e:2x2
jax: 0.10.0
libtpu: 0.0.40
codegen_flags: <defaults>
</compile_context>

<pallas_src>
import functools

import jax
import jax.numpy as jnp
from jax.experimental import pallas as pl
from jax.experimental.pallas import tpu as pltpu


def _round_up(n, m):
    return ((n + m - 1) // m) * m


def _mlp_kernel(x_ref,
                w1_ref, b1_ref,
                w2_ref, b2_ref,
                w3_ref, b3_ref,
                w4_ref, b4_ref,
                w5_ref, b5_ref,
                o_ref):
    """Fused 5-layer MLP: bf16 matmuls on the MXU (f32 accum), VPU epilogues."""
    cdt = w1_ref.dtype  # bf16 MXU operand dtype

    # In-kernel cast of the f32 LHS tile (x is read from HBM as f32; the
    # kernel is MXU-bound, so the 2x larger DMA is free and we avoid a
    # wrapper-side bf16 copy of x in HBM).
    x = x_ref[...].astype(cdt)

    def dense_relu(h, w_ref, b_ref):
        z = jnp.dot(h, w_ref[...], preferred_element_type=jnp.float32)
        # Epilogue dtype follows the bias dtype (bf16 on v6e/v7x, f32 on v5e).
        z = jnp.maximum(z.astype(b_ref.dtype) + b_ref[...], 0)
        return z.astype(cdt)                      # feed next MXU dot in bf16

    h = dense_relu(x, w1_ref, b1_ref)             # (bm, 256)
    h = dense_relu(h, w2_ref, b2_ref)             # (bm, 256)
    h = dense_relu(h, w3_ref, b3_ref)             # (bm, 64)

    # fc4 (64 -> 16): MXU with f32 output kept for the f32 fc5 path.
    h4 = jnp.dot(h, w4_ref[...], preferred_element_type=jnp.float32)
    h4 = jnp.maximum(h4 + b4_ref[...], 0.0)       # (bm, 16) f32

    # fc5 (16 -> 1): VPU broadcast-multiply + lane reduction instead of an
    # N=1 MXU push (which would use 1/256 of the output lanes).
    z = jnp.sum(h4 * w5_ref[...], axis=-1, keepdims=True) + b5_ref[...]
    o_ref[...] = jax.nn.sigmoid(z).astype(o_ref.dtype)


@functools.partial(jax.jit, static_argnames=("block_m", "bf16_epilogue"))
def solver_evaluator_forward(x, params, *, block_m=2048, bf16_epilogue=True):
    """Runs the fused MLP. x: (B, input_size) float32. Returns (B, 1) float32.

    block_m: batch tile target (sweep 1024-4096; multiples of 256 fill the
    v6e/v7x MXU, 128 suffices on v5e).  bf16_epilogue: set False on v5e
    (no bf16 VPU path there).
    """
    B, F = x.shape
    (w1, b1), (w2, b2), (w3, b3), (w4, b4), (w5, b5) = params

    cdt = jnp.bfloat16
    epi = cdt if bf16_epilogue else jnp.float32

    # Weights/biases are tiny (~180 KiB in bf16): cast once in the wrapper.
    w1c, w2c, w3c, w4c = (w.astype(cdt) for w in (w1, w2, w3, w4))
    b1c, b2c, b3c = (b.astype(epi) for b in (b1, b2, b3))
    b4f = b4.astype(jnp.float32)
    w5r = w5.astype(jnp.float32).reshape(1, -1)   # (1, 16) row for the VPU path
    b5f = b5.astype(jnp.float32).reshape(1, 1)

    # Batch tile selection:
    #   * target block_m rounded to a multiple of 128,
    #   * but keep >= 2 grid steps when the batch allows a full 128-row tile
    #     per step (v7x: the "parallel" grid axis is what feeds its 2 TCs),
    #   * never larger than the (sublane-rounded) batch.
    # No padding: grid = cdiv(B, bm); Pallas masks the ragged last block's
    # output writeback, and the garbage rows of the last input tile never mix
    # with valid rows (everything is row-wise independent).
    bm = _round_up(block_m, 128)
    bm = min(bm, max(128, _round_up((B + 1) // 2, 128)))
    bm = min(bm, _round_up(B, 8))
    grid = pl.cdiv(B, bm)

    def rep(a):
        # Full-tensor block with a constant block index: stays VMEM-resident
        # across grid steps (Mosaic revisit optimization -> no per-step DMA).
        return pl.BlockSpec(a.shape, lambda i: (0, 0))

    out = pl.pallas_call(
        _mlp_kernel,
        out_shape=jax.ShapeDtypeStruct((B, 1), jnp.float32),
        grid=(grid,),
        in_specs=[
            pl.BlockSpec((bm, F), lambda i: (i, 0)),
            rep(w1c), rep(b1c),
            rep(w2c), rep(b2c),
            rep(w3c), rep(b3c),
            rep(w4c), rep(b4f),
            rep(w5r), rep(b5f),
        ],
        out_specs=pl.BlockSpec((bm, 1), lambda i: (i, 0)),
        compiler_params=pltpu.CompilerParams(
            dimension_semantics=("parallel",),
            vmem_limit_bytes=48 * 1024 * 1024),
    )(x, w1c, b1c, w2c, b2c, w3c, b3c, w4c, b4f, w5r, b5f)

    return out


def init_params(key, input_size):
    """Deterministic init matching PyTorch nn.Linear shapes.

    PyTorch stores W as (out, in); we store the transposed (in, out) layout.
    Uses uniform(-1/sqrt(fan_in), 1/sqrt(fan_in)) like nn.Linear's default.
    """
    sizes = [(input_size, 256), (256, 256), (256, 64), (64, 16), (16, 1)]
    params = []
    for (fan_in, fan_out) in sizes:
        key, kw, kb = jax.random.split(key, 3)
        bound = 1.0 / jnp.sqrt(jnp.float32(fan_in))
        w = jax.random.uniform(kw, (fan_in, fan_out), jnp.float32, -bound, bound)
        b = jax.random.uniform(kb, (1, fan_out), jnp.float32, -bound, bound)
        params.append((w, b))
    return params


def reference_forward(x, params):
    """Pure-JAX f32 reference for correctness checking."""
    (w1, b1), (w2, b2), (w3, b3), (w4, b4), (w5, b5) = params
    h = jnp.maximum(x @ w1 + b1, 0.0)
    h = jnp.maximum(h @ w2 + b2, 0.0)
    h = jnp.maximum(h @ w3 + b3, 0.0)
    h = jnp.maximum(h @ w4 + b4, 0.0)
    return jax.nn.sigmoid(h @ w5 + b5)


if __name__ == "__main__":
    key = jax.random.PRNGKey(0)
    input_size = 32
    batch = 200   # >128 and not a multiple of the tile: exercises the
                  # multi-step "parallel" grid and the ragged (masked) last block.

    kx, kp = jax.random.split(key)
    x = jax.random.normal(kx, (batch, input_size), jnp.float32)
    params = init_params(kp, input_size)

    out = jax.block_until_ready(solver_evaluator_forward(x, params))

    ref = reference_forward(x, params)
    assert out.shape == (batch, 1)
    max_err = float(jnp.max(jnp.abs(out - ref)))
    # bf16 MXU operands + bf16 epilogues with f32 accumulation vs f32 reference.
    assert max_err < 3e-2, f"mismatch vs reference: max abs err {max_err}"

    print("KERNEL_OK")
</pallas_src>

<mosaic_0001>
module attributes {stable_mosaic.version = 11 : i64} {
  func.func @_mlp_kernel(%arg0: i32, %arg1: memref<128x32xf32, #tpu.memory_space<vmem>>, %arg2: memref<32x256xbf16, #tpu.memory_space<vmem>>, %arg3: memref<1x256xbf16, #tpu.memory_space<vmem>>, %arg4: memref<256x256xbf16, #tpu.memory_space<vmem>>, %arg5: memref<1x256xbf16, #tpu.memory_space<vmem>>, %arg6: memref<256x64xbf16, #tpu.memory_space<vmem>>, %arg7: memref<1x64xbf16, #tpu.memory_space<vmem>>, %arg8: memref<64x16xbf16, #tpu.memory_space<vmem>>, %arg9: memref<1x16xf32, #tpu.memory_space<vmem>>, %arg10: memref<1x16xf32, #tpu.memory_space<vmem>>, %arg11: memref<1x1xf32, #tpu.memory_space<vmem>>, %arg12: memref<128x1xf32, #tpu.memory_space<vmem>>) attributes {dimension_semantics = [#tpu.dimension_semantics<parallel>], iteration_bounds = array<i64: 2>, scalar_prefetch = 0 : i64, scratch_operands = 0 : i64, tpu.core_type = #tpu.core_type<tc>, window_params = [{transform_indices = @transform_0, window_bounds = array<i64: 128, 32>}, {pipeline_mode = #tpu.pipeline_mode<synchronous>, transform_indices = @transform_1, window_bounds = array<i64: 32, 256>}, {pipeline_mode = #tpu.pipeline_mode<synchronous>, transform_indices = @transform_2, window_bounds = array<i64: 1, 256>}, {pipeline_mode = #tpu.pipeline_mode<synchronous>, transform_indices = @transform_3, window_bounds = array<i64: 256, 256>}, {pipeline_mode = #tpu.pipeline_mode<synchronous>, transform_indices = @transform_4, window_bounds = array<i64: 1, 256>}, {pipeline_mode = #tpu.pipeline_mode<synchronous>, transform_indices = @transform_5, window_bounds = array<i64: 256, 64>}, {pipeline_mode = #tpu.pipeline_mode<synchronous>, transform_indices = @transform_6, window_bounds = array<i64: 1, 64>}, {pipeline_mode = #tpu.pipeline_mode<synchronous>, transform_indices = @transform_7, window_bounds = array<i64: 64, 16>}, {pipeline_mode = #tpu.pipeline_mode<synchronous>, transform_indices = @transform_8, window_bounds = array<i64: 1, 16>}, {pipeline_mode = #tpu.pipeline_mode<synchronous>, transform_indices = @transform_9, window_bounds = array<i64: 1, 16>}, {pipeline_mode = #tpu.pipeline_mode<synchronous>, transform_indices = @transform_10, window_bounds = array<i64: 1, 1>}, {transform_indices = @transform_11, window_bounds = array<i64: 128, 1>}]} {
    %c0 = arith.constant 0 : index
    %c0_0 = arith.constant 0 : index
    %0 = vector.load %arg1[%c0, %c0_0] : memref<128x32xf32, #tpu.memory_space<vmem>>, vector<128x32xf32>
    %1 = arith.truncf %0 : vector<128x32xf32> to vector<128x32xbf16>
    %c0_1 = arith.constant 0 : index
    %c0_2 = arith.constant 0 : index
    %2 = vector.load %arg2[%c0_1, %c0_2] : memref<32x256xbf16, #tpu.memory_space<vmem>>, vector<32x256xbf16>
    %cst = arith.constant dense<0.000000e+00> : vector<128x256xf32>
    %3 = tpu.matmul %1, %2, %cst {dimension_numbers = #tpu.dot_dimension_numbers<[1], [0], [0], [1], [0, 0, 1, 1], [], []>} : vector<128x32xbf16>, vector<32x256xbf16>, vector<128x256xf32> -> vector<128x256xf32>
    %4 = arith.truncf %3 : vector<128x256xf32> to vector<128x256xbf16>
    %c0_3 = arith.constant 0 : index
    %c0_4 = arith.constant 0 : index
    %5 = vector.load %arg3[%c0_3, %c0_4] : memref<1x256xbf16, #tpu.memory_space<vmem>>, vector<1x256xbf16>
    %6 = vector.broadcast %5 : vector<1x256xbf16> to vector<128x256xbf16>
    %7 = arith.addf %4, %6 : vector<128x256xbf16>
    %cst_5 = arith.constant 0.000000e+00 : bf16
    %8 = vector.broadcast %cst_5 : bf16 to vector<128x256xbf16>
    %9 = arith.maximumf %7, %8 : vector<128x256xbf16>
    %c0_6 = arith.constant 0 : index
    %c0_7 = arith.constant 0 : index
    %10 = vector.load %arg4[%c0_6, %c0_7] : memref<256x256xbf16, #tpu.memory_space<vmem>>, vector<256x256xbf16>
    %cst_8 = arith.constant dense<0.000000e+00> : vector<128x256xf32>
    %11 = tpu.matmul %9, %10, %cst_8 {dimension_numbers = #tpu.dot_dimension_numbers<[1], [0], [0], [1], [0, 0, 1, 1], [], []>} : vector<128x256xbf16>, vector<256x256xbf16>, vector<128x256xf32> -> vector<128x256xf32>
    %12 = arith.truncf %11 : vector<128x256xf32> to vector<128x256xbf16>
    %c0_9 = arith.constant 0 : index
    %c0_10 = arith.constant 0 : index
    %13 = vector.load %arg5[%c0_9, %c0_10] : memref<1x256xbf16, #tpu.memory_space<vmem>>, vector<1x256xbf16>
    %14 = vector.broadcast %13 : vector<1x256xbf16> to vector<128x256xbf16>
    %15 = arith.addf %12, %14 : vector<128x256xbf16>
    %cst_11 = arith.constant 0.000000e+00 : bf16
    %16 = vector.broadcast %cst_11 : bf16 to vector<128x256xbf16>
    %17 = arith.maximumf %15, %16 : vector<128x256xbf16>
    %c0_12 = arith.constant 0 : index
    %c0_13 = arith.constant 0 : index
    %18 = vector.load %arg6[%c0_12, %c0_13] : memref<256x64xbf16, #tpu.memory_space<vmem>>, vector<256x64xbf16>
    %cst_14 = arith.constant dense<0.000000e+00> : vector<128x64xf32>
    %19 = tpu.matmul %17, %18, %cst_14 {dimension_numbers = #tpu.dot_dimension_numbers<[1], [0], [0], [1], [0, 0, 1, 1], [], []>} : vector<128x256xbf16>, vector<256x64xbf16>, vector<128x64xf32> -> vector<128x64xf32>
    %20 = arith.truncf %19 : vector<128x64xf32> to vector<128x64xbf16>
    %c0_15 = arith.constant 0 : index
    %c0_16 = arith.constant 0 : index
    %21 = vector.load %arg7[%c0_15, %c0_16] : memref<1x64xbf16, #tpu.memory_space<vmem>>, vector<1x64xbf16>
    %22 = vector.broadcast %21 : vector<1x64xbf16> to vector<128x64xbf16>
    %23 = arith.addf %20, %22 : vector<128x64xbf16>
    %cst_17 = arith.constant 0.000000e+00 : bf16
    %24 = vector.broadcast %cst_17 : bf16 to vector<128x64xbf16>
    %25 = arith.maximumf %23, %24 : vector<128x64xbf16>
    %c0_18 = arith.constant 0 : index
    %c0_19 = arith.constant 0 : index
    %26 = vector.load %arg8[%c0_18, %c0_19] : memref<64x16xbf16, #tpu.memory_space<vmem>>, vector<64x16xbf16>
    %cst_20 = arith.constant dense<0.000000e+00> : vector<128x16xf32>
    %27 = tpu.matmul %25, %26, %cst_20 {dimension_numbers = #tpu.dot_dimension_numbers<[1], [0], [0], [1], [0, 0, 1, 1], [], []>} : vector<128x64xbf16>, vector<64x16xbf16>, vector<128x16xf32> -> vector<128x16xf32>
    %c0_21 = arith.constant 0 : index
    %c0_22 = arith.constant 0 : index
    %28 = vector.load %arg9[%c0_21, %c0_22] : memref<1x16xf32, #tpu.memory_space<vmem>>, vector<1x16xf32>
    %29 = vector.broadcast %28 : vector<1x16xf32> to vector<128x16xf32>
    %30 = arith.addf %27, %29 : vector<128x16xf32>
    %cst_23 = arith.constant 0.000000e+00 : f32
    %31 = vector.broadcast %cst_23 : f32 to vector<128x16xf32>
    %32 = arith.maximumf %30, %31 : vector<128x16xf32>
    %c0_24 = arith.constant 0 : index
    %c0_25 = arith.constant 0 : index
    %33 = vector.load %arg10[%c0_24, %c0_25] : memref<1x16xf32, #tpu.memory_space<vmem>>, vector<1x16xf32>
    %34 = vector.broadcast %33 : vector<1x16xf32> to vector<128x16xf32>
    %35 = arith.mulf %32, %34 : vector<128x16xf32>
    %cst_26 = arith.constant dense<0.000000e+00> : vector<128xf32>
    %36 = vector.multi_reduction <add>, %35, %cst_26 [1] : vector<128x16xf32> to vector<128xf32>
    %37 = vector.shape_cast %36 : vector<128xf32> to vector<128x1xf32>
    %c0_27 = arith.constant 0 : index
    %c0_28 = arith.constant 0 : index
    %38 = vector.load %arg11[%c0_27, %c0_28] : memref<1x1xf32, #tpu.memory_space<vmem>>, vector<1x1xf32>
    %39 = vector.broadcast %38 : vector<1x1xf32> to vector<128x1xf32>
    %40 = arith.addf %37, %39 : vector<128x1xf32>
    %41 = arith.negf %40 : vector<128x1xf32>
    %42 = math.exp %41 : vector<128x1xf32>
    %cst_29 = arith.constant 1.000000e+00 : f32
    %43 = vector.broadcast %cst_29 : f32 to vector<128x1xf32>
    %44 = arith.addf %43, %42 : vector<128x1xf32>
    %45 = arith.divf %43, %44 : vector<128x1xf32>
    %c0_30 = arith.constant 0 : index
    %c0_31 = arith.constant 0 : index
    %46 = vector.load %arg12[%c0_30, %c0_31] : memref<128x1xf32, #tpu.memory_space<vmem>>, vector<128x1xf32>
    tpu.vector_store %arg12[%c0_30, %c0_31], %45 {strides = array<i32>} : memref<128x1xf32, #tpu.memory_space<vmem>>, vector<128x1xf32>,
    return
  }
  func.func @transform_0(%arg0: i32) -> (i32, i32) {
    %c0_i32 = arith.constant 0 : i32
    %c0_i32_0 = arith.constant 0 : i32
    return %arg0, %c0_i32 : i32, i32
  }
  func.func @transform_1(%arg0: i32) -> (i32, i32) {
    %c0_i32 = arith.constant 0 : i32
    %c0_i32_0 = arith.constant 0 : i32
    %c0_i32_1 = arith.constant 0 : i32
    return %c0_i32, %c0_i32_0 : i32, i32
  }
  func.func @transform_2(%arg0: i32) -> (i32, i32) {
    %c0_i32 = arith.constant 0 : i32
    %c0_i32_0 = arith.constant 0 : i32
    %c0_i32_1 = arith.constant 0 : i32
    return %c0_i32, %c0_i32_0 : i32, i32
  }
  func.func @transform_3(%arg0: i32) -> (i32, i32) {
    %c0_i32 = arith.constant 0 : i32
    %c0_i32_0 = arith.constant 0 : i32
    %c0_i32_1 = arith.constant 0 : i32
    return %c0_i32, %c0_i32_0 : i32, i32
  }
  func.func @transform_4(%arg0: i32) -> (i32, i32) {
    %c0_i32 = arith.constant 0 : i32
    %c0_i32_0 = arith.constant 0 : i32
    %c0_i32_1 = arith.constant 0 : i32
    return %c0_i32, %c0_i32_0 : i32, i32
  }
  func.func @transform_5(%arg0: i32) -> (i32, i32) {
    %c0_i32 = arith.constant 0 : i32
    %c0_i32_0 = arith.constant 0 : i32
    %c0_i32_1 = arith.constant 0 : i32
    return %c0_i32, %c0_i32_0 : i32, i32
  }
  func.func @transform_6(%arg0: i32) -> (i32, i32) {
    %c0_i32 = arith.constant 0 : i32
    %c0_i32_0 = arith.constant 0 : i32
    %c0_i32_1 = arith.constant 0 : i32
    return %c0_i32, %c0_i32_0 : i32, i32
  }
  func.func @transform_7(%arg0: i32) -> (i32, i32) {
    %c0_i32 = arith.constant 0 : i32
    %c0_i32_0 = arith.constant 0 : i32
    %c0_i32_1 = arith.constant 0 : i32
    return %c0_i32, %c0_i32_0 : i32, i32
  }
  func.func @transform_8(%arg0: i32) -> (i32, i32) {
    %c0_i32 = arith.constant 0 : i32
    %c0_i32_0 = arith.constant 0 : i32
    %c0_i32_1 = arith.constant 0 : i32
    return %c0_i32, %c0_i32_0 : i32, i32
  }
  func.func @transform_9(%arg0: i32) -> (i32, i32) {
    %c0_i32 = arith.constant 0 : i32
    %c0_i32_0 = arith.constant 0 : i32
    %c0_i32_1 = arith.constant 0 : i32
    return %c0_i32, %c0_i32_0 : i32, i32
  }
  func.func @transform_10(%arg0: i32) -> (i32, i32) {
    %c0_i32 = arith.constant 0 : i32
    %c0_i32_0 = arith.constant 0 : i32
    %c0_i32_1 = arith.constant 0 : i32
    return %c0_i32, %c0_i32_0 : i32, i32
  }
  func.func @transform_11(%arg0: i32) -> (i32, i32) {
    %c0_i32 = arith.constant 0 : i32
    %c0_i32_0 = arith.constant 0 : i32
    return %arg0, %c0_i32 : i32, i32
  }
}

</mosaic_0001>

<bundles_post_ra>
// kernel: solver_evaluator_forward.1
= control target key start
LH: loop header
LB: loop body
LE: loop exit
PB: predicated region body
PF: predicated region fallthrough
CT: control target
= control target key end

     0   :  { %s3850_s0 = inlined_call_operand.vmem [shape: f32[200,32], index: 0, kind: input, shape index: {}]   ;;  %s3851_s1 = inlined_call_operand.vmem [shape: bf16[32,256], index: 1, kind: input, shape index: {}]   ;;  %s3852_s2 = inlined_call_operand.vmem [shape: bf16[1,256], index: 2, kind: input, shape index: {}]   ;;  %s3853_s3 = inlined_call_operand.vmem [shape: bf16[256,256], index: 3, kind: input, shape index: {}]   ;;  %s3854_s4 = inlined_call_operand.vmem [shape: bf16[1,256], index: 4, kind: input, shape index: {}]   ;;  %s3855_s5 = inlined_call_operand.vmem [shape: bf16[256,64], index: 5, kind: input, shape index: {}]   ;;  %s3856_s6 = inlined_call_operand.vmem [shape: bf16[1,64], index: 6, kind: input, shape index: {}]   ;;  %s3857_s7 = inlined_call_operand.vmem [shape: bf16[64,16], index: 7, kind: input, shape index: {}]   ;;  %s3858_s8 = inlined_call_operand.vmem [shape: f32[1,16], index: 8, kind: input, shape index: {}]   ;;  %s3859_s9 = inlined_call_operand.vmem [shape: f32[1,16], index: 9, kind: input, shape index: {}]   ;;  %s3860_s10 = inlined_call_operand.<no memory space> [shape: f32[1,1], index: 10, kind: input, shape index: {}]   ;;  %s3861_s11 = inlined_call_operand.vmem [shape: f32[200,1], index: 11, kind: output, shape index: {}]  }
   0x1   :  { %v16_v0 = vstv %s3860_s10 }
   0x2   :  { %17 = vst [vmem:[#allocation2] sm:$0x1] %v16_v0 }
   0x3   :  { %s3155_s19 = smov 0   ;;  %s3157_s20 = smov 0  }
   0x4   :  { %s3159_s21 = smov 0  }
   0x5 LB: > { %s3168_s10 = sadd.s32 4294967295, %s3058_s21   ;;  %s3170_s22 = sadd.s32 1, %s3058_s21   ;;  %s3058_s21 = sphi %s3159_s21, %s3870_s21   ;;  %s3054_s20 = sphi %s3157_s20, %s3869_s20   ;;  %s3050_s19 = sphi %s3155_s19, %s3868_s19  }
   0x6   : > { %s263_s23 = ssub.s32 %s3058_s21, %s3170_s22  ;;  %s266_s24 = sadd.s32 1, %s3054_s20 }
   0x7   : > { %p264_p0 = scmp.eq.s32.totalorder %s263_s23, 0  ;;  %p276_p1 = scmp.ne.s32.totalorder %s3054_s20, %s3050_s19 }
   0x8   : > { %p277_p2 = scmp.eq.s32.totalorder %s3168_s10, 1  ;;  %p2499_p3 = scmp.ge.s32.totalorder %s3058_s21, 1 }
   0x9   : > { %s3178_s25 = scalar_select %p264_p0, %s3054_s20, %s266_s24  }
   0xa   : > { %p3180_p4 = por %p277_p2, %p276_p1  ;;  %p348_p5 = scmp.lt.s32.totalorder %s3058_s21, 3 }
   0xc   : > { %p349_p6 = pnand %p2499_p3, %p348_p5 }
   0xd   : > { %s3197_s16 = sshll.u32 (!%p349_p6), %s3168_s10, 4  ;;  %s388_s13 = sand.u32 (!%p349_p6), 1, %s3050_s19  }
   0xe   : > { %352 = sbr.rel (%p349_p6) target bundleno = 973 (0x3cd), region = 64  ;;  %p396_p7 = scmp.lt.s32.totalorder (!%p349_p6), %s3197_s16, 24 }
   0xf   : > { %s2500_s14 = sshll.u32 (!%p349_p6), %s388_s13, 7 }
  0x10   : > { %s3700_s19 = scalar_lea.vmem (!%p349_p6), [#allocation3], %s2500_s14  }
  0x13   : > { %v2513_v1 = vld [vmem:[%s3851_s1 + $0x10] sm:$0xf]  ;;  %v2787_v2 = vld [vmem:[%s3851_s1 + $0x14] sm:$0xf0]  ;;  %v2505_v3 = vld [vmem:[%s3851_s1] sm:$0xf] }
  0x14   : > { %v2514_v4 = vor.u32 %v2787_v2, %v2513_v1  ;;  %v2785_v5 = vld [vmem:[%s3851_s1 + $0x4] sm:$0xf0]  ;;  %v2786_v6 = vld [vmem:[%s3851_s1 + $0x14] sm:$0xf]  ;;  %v2515_v7 = vld [vmem:[%s3851_s1 + $0x18] sm:$0xf0] }
  0x15   : > { %v2506_v8 = vor.u32 %v2785_v5, %v2505_v3  ;;  %s397_s24 = scalar_select %p396_p7, %s3197_s16, 24  ;;  %v2518_v9 = vor.u32 %v2786_v6, %v2515_v7  ;;  %v2784_v10 = vld [vmem:[%s3851_s1 + $0x4] sm:$0xf]  ;;  %v2507_v11 = vld [vmem:[%s3851_s1 + $0x8] sm:$0xf0]  ;;  %vm459_vm0 = vcmask 261120  }
  0x16   : > { %2843 = vmatpush.bf16.msra.mxu1 %v2514_v4  ;;  %490 = vmatpush.bf16.msra.mxu0 %v2514_v4  ;;  %v2510_v14 = vor.u32 %v2784_v10, %v2507_v11  ;;  %v2818_v28 = vld [vmem:[%s3853_s3 + $0xf4] sm:$0xf]  ;;  %v2659_v29 = vld [vmem:[%s3853_s3 + $0xf8] sm:$0xf0]  ;;  %v2816_v31 = vld [vmem:[%s3853_s3 + $0xe4] sm:$0xf] }
  0x17   : > { %2844 = vmatpush.bf16.msra.mxu2 %v2514_v4  ;;  %2845 = vmatpush.bf16.msra.mxu3 %v2514_v4  ;;  %s2502_s12 = sshll.u32 %s397_s24, 3  ;;  %v2662_v30 = vor.u32 %v2818_v28, %v2659_v29  ;;  %v2651_v32 = vld [vmem:[%s3853_s3 + $0xe8] sm:$0xf0]  ;;  %v2814_v34 = vld [vmem:[%s3853_s3 + $0xd4] sm:$0xf]  ;;  %vm1720_vm1 = vcmask 523264  }
  0x18   : > { %s3216_s15 = scalar_lea.vmem %s3850_s0, %s2502_s12  ;;  %v2654_v33 = vor.u32 %v2816_v31, %v2651_v32  ;;  %v2643_v35 = vld [vmem:[%s3853_s3 + $0xd8] sm:$0xf0]  ;;  %v2812_v40 = vld [vmem:[%s3853_s3 + $0xc4] sm:$0xf]  ;;  %v2635_v41 = vld [vmem:[%s3853_s3 + $0xc8] sm:$0xf0] }
  0x19   : > { %v415_v12 = vld [vmem:[%s3216_s15 + $0x20] sm:$0xff]  ;;  %v416_v13 = vld [vmem:[%s3216_s15 + $0x28] sm:$0xff]  ;;  %v417_v19 = vld [vmem:[%s3216_s15 + $0x30] sm:$0xff]  ;;  %v2646_v36 = vor.u32 %v2814_v34, %v2643_v35  ;;  %v2638_v42 = vor.u32 %v2812_v40, %v2635_v41  ;;  %vm1830_vm2 = vcmask 130048   ;;  %vm2203_vm5 = vcmask 7168   ;;  %s2840_s17 = sshll.u32 (%p3180_p4), %s3168_s10, 7 }
  0x1a   : > { %2846 = vmatpush.bf16.msra.mxu1 %v2506_v8  ;;  %491 = vmatpush.bf16.msra.mxu0 %v2506_v8  ;;  %v429_v15 = vpack.c.bf16 %v416_v13, %v415_v12  ;;  %v411_v16 = vld [vmem:[%s3216_s15] sm:$0xff]  ;;  %v412_v17 = vld [vmem:[%s3216_s15 + $0x8] sm:$0xff]  ;;  %v418_v20 = vld [vmem:[%s3216_s15 + $0x38] sm:$0xff]  ;;  %s3753_s23 = scalar_lea.vmem (%p3180_p4), %s3861_s11, %s2840_s17  }
  0x1b   : > { %2847 = vmatpush.bf16.msra.mxu2 %v2506_v8  ;;  %2848 = vmatpush.bf16.msra.mxu3 %v2506_v8  ;;  %v427_v18 = vpack.c.bf16 %v412_v17, %v411_v16  ;;  %v430_v21 = vpack.c.bf16 %v418_v20, %v417_v19  ;;  %v413_v22 = vld [vmem:[%s3216_s15 + $0x10] sm:$0xff]  ;;  %v414_v23 = vld [vmem:[%s3216_s15 + $0x18] sm:$0xff]  ;;  %v419_v25 = vld [vmem:[%s3216_s15 + $0x40] sm:$0xff] }
  0x1c   : > { %v428_v24 = vpack.c.bf16 %v414_v23, %v413_v22  ;;  %v420_v26 = vld [vmem:[%s3216_s15 + $0x48] sm:$0xff]  ;;  %v421_v37 = vld [vmem:[%s3216_s15 + $0x50] sm:$0xff]  ;;  %v422_v38 = vld [vmem:[%s3216_s15 + $0x58] sm:$0xff] }
  0x1d   : > { %2521 = vmatmul.msk.bf16.vlgmr.msra.gmra.mxu1 %vm459_vm0, %v429_v15  ;;  %2519 = vmatmul.msk.bf16.vlgmr.msra.gmra.mxu0 %vm459_vm0, %v427_v18  ;;  %v431_v27 = vpack.c.bf16 %v420_v26, %v419_v25  ;;  %v432_v39 = vpack.c.bf16 %v422_v38, %v421_v37  ;;  %v423_v43 = vld [vmem:[%s3216_s15 + $0x60] sm:$0xff]  ;;  %v424_v44 = vld [vmem:[%s3216_s15 + $0x68] sm:$0xff]  ;;  %v2810_v46 = vld [vmem:[%s3853_s3 + $0xb4] sm:$0xf] }
  0x1e   : > { %539 = vmatpush.bf16.msrb.mxu1 %v2518_v9  ;;  %v3266_v45 = vpack.c.bf16 %v424_v44, %v423_v43  ;;  %v2627_v47 = vld [vmem:[%s3853_s3 + $0xb8] sm:$0xf0]  ;;  %v425_v49 = vld [vmem:[%s3216_s15 + $0x70] sm:$0xff]  ;;  %v2808_v52 = vld [vmem:[%s3853_s3 + $0xa4] sm:$0xf] }
  0x1f   : > { %2524 = vmatmul.msk.bf16.vlgmr.msra.gmra.mxu2 %vm459_vm0, %v432_v39  ;;  %v2630_v48 = vor.u32 %v2810_v46, %v2627_v47  ;;  %v426_v50 = vld [vmem:[%s3216_s15 + $0x78] sm:$0xff]  ;;  %v2619_v53 = vld [vmem:[%s3853_s3 + $0xa8] sm:$0xf0]  ;;  %v2593_v56 = vld [vmem:[%s3853_s3 + $0x70] sm:$0xf]  ;;  %s2228_s15 = ssub.s32 (%p3180_p4), 25, %s3197_s16 }
  0x20   : > { %v3279_v51 = vpack.c.bf16 %v426_v50, %v425_v49  ;;  %v2622_v54 = vor.u32 %v2808_v52, %v2619_v53  ;;  %v2803_v57 = vld [vmem:[%s3853_s3 + $0x74] sm:$0xf0]  ;;  %v2657_v58 = vld [vmem:[%s3853_s3 + $0xf0] sm:$0xf]  ;;  %v2802_v61 = vld [vmem:[%s3853_s3 + $0x74] sm:$0xf] }
  0x21   : > { %v2594_v59 = vor.u32 %v2803_v57, %v2593_v56  ;;  %v2819_v60 = vld [vmem:[%s3853_s3 + $0xf4] sm:$0xf0]  ;;  %v2595_v62 = vld [vmem:[%s3853_s3 + $0x78] sm:$0xf0]  ;;  %v2585_v1 = vld [vmem:[%s3853_s3 + $0x60] sm:$0xf] }
  0x22   : > { %540 = vmatpush.bf16.msrb.mxu1 %v2510_v14  ;;  %2526 = vmatmul.msk.bf16.vlgmr.msra.gmra.mxu3 %vm459_vm0, %v3279_v51  ;;  %v2658_v63 = vor.u32 %v2819_v60, %v2657_v58  ;;  %v2598_v0 = vor.u32 %v2802_v61, %v2595_v62  ;;  %v2801_v2 = vld [vmem:[%s3853_s3 + $0x64] sm:$0xf0]  ;;  %v2649_v4 = vld [vmem:[%s3853_s3 + $0xe0] sm:$0xf]  ;;  %v2800_v6 = vld [vmem:[%s3853_s3 + $0x64] sm:$0xf] }
  0x23   : > { %963 = vmatpush.bf16.msrb.mxu2 %v2594_v59  ;;  %v2586_v3 = vor.u32 %v2801_v2, %v2585_v1  ;;  %v2817_v5 = vld [vmem:[%s3853_s3 + $0xe4] sm:$0xf0]  ;;  %v2587_v8 = vld [vmem:[%s3853_s3 + $0x68] sm:$0xf0]  ;;  %v598_v9 = vld [vmem:[%s3852_s2] sm:$0x3] }
  0x24   : > { %1012 = vmatpush.bf16.msrb.mxu3 %v2658_v63  ;;  %1061 = vmatpush.bf16.msrb.mxu0 %v2598_v0  ;;  %v2650_v7 = vor.u32 %v2817_v5, %v2649_v4  ;;  %v2590_v10 = vor.u32 %v2800_v6, %v2587_v8  ;;  %600 = vst [vmem:[#allocation1] ss:$9 sm:$0xff] %v598_v9  ;;  %v2806_v12 = vld [vmem:[%s3853_s3 + $0x94] sm:$0xf]  ;;  %v2611_v13 = vld [vmem:[%s3853_s3 + $0x98] sm:$0xf0] }
  0x25   : > { %v2577_v14 = vld [vmem:[%s3853_s3 + $0x50] sm:$0xf]  ;;  %v2799_v16 = vld [vmem:[%s3853_s3 + $0x54] sm:$0xf0]  ;;  %v2579_v22 = vld [vmem:[%s3853_s3 + $0x58] sm:$0xf0] }
  0x26   : > { %1110 = vmatpush.bf16.msra.mxu1 %v2662_v30  ;;  %v2641_v17 = vld [vmem:[%s3853_s3 + $0xd0] sm:$0xf]  ;;  %v2578_v19 = vor.u32 %v2799_v16, %v2577_v14  ;;  %v2569_v23 = vld [vmem:[%s3853_s3 + $0x40] sm:$0xf]  ;;  %v2797_v25 = vld [vmem:[%s3853_s3 + $0x44] sm:$0xf0] }
  0x27   : > { %964 = vmatpush.bf16.msrb.mxu2 %v2586_v3  ;;  %v2570_v26 = vor.u32 %v2797_v25, %v2569_v23  ;;  %v2813_v28 = vld [vmem:[%s3853_s3 + $0xc4] sm:$0xf0]  ;;  %v2796_v29 = vld [vmem:[%s3853_s3 + $0x44] sm:$0xf]  ;;  %v2571_v31 = vld [vmem:[%s3853_s3 + $0x48] sm:$0xf0] }
  0x28   : > { %1013 = vmatpush.bf16.msrb.mxu3 %v2650_v7  ;;  %1062 = vmatpush.bf16.msrb.mxu0 %v2590_v10  ;;  %v2574_v32 = vor.u32 %v2796_v29, %v2571_v31  ;;  %v2561_v34 = vld [vmem:[%s3853_s3 + $0x30] sm:$0xf]  ;;  %v2795_v35 = vld [vmem:[%s3853_s3 + $0x34] sm:$0xf0]  ;;  %v2563_v41 = vld [vmem:[%s3853_s3 + $0x38] sm:$0xf0] }
  0x29   : > { %v2625_v37 = vld [vmem:[%s3853_s3 + $0xb0] sm:$0xf]  ;;  %v2811_v38 = vld [vmem:[%s3853_s3 + $0xb4] sm:$0xf0]  ;;  %v2553_v43 = vld [vmem:[%s3853_s3 + $0x20] sm:$0xf] }
  0x2a   : > { %1111 = vmatpush.bf16.msra.mxu1 %v2654_v33  ;;  %v2626_v40 = vor.u32 %v2811_v38, %v2625_v37  ;;  %v2793_v44 = vld [vmem:[%s3853_s3 + $0x24] sm:$0xf0]  ;;  %v2555_v49 = vld [vmem:[%s3853_s3 + $0x28] sm:$0xf0]  ;;  %v1175_v53 = vld [vmem:[%s3854_s4] sm:$0x3] }
  0x2b   : > { %965 = vmatpush.bf16.msrb.mxu2 %v2578_v19  ;;  %v2554_v46 = vor.u32 %v2793_v44, %v2553_v43  ;;  %v2809_v47 = vld [vmem:[%s3853_s3 + $0xa4] sm:$0xf0]  ;;  %v601_v50 = vld [vmem:[#allocation1] sm:$0xff]  ;;  %v2545_v58 = vld [vmem:[%s3853_s3 + $0x10] sm:$0xf]  ;;  %p2229_p8 = scmp.lt.s32.totalorder (%p3180_p4), %s2228_s15, 16 }
  0x2c   : > { %v602_v52 = vld [vmem:[#allocation1 + $0x9] sm:$0xff]  ;;  %v2791_v59 = vld [vmem:[%s3853_s3 + $0x14] sm:$0xf0]  ;;  %v2790_v63 = vld [vmem:[%s3853_s3 + $0x14] sm:$0xf]  ;;  %v603_v19 = vpack.i.b16 %v601_v50, %v601_v50 }
  0x2d   : > { %2522 = vmatmul.msk.bf16.gmra.mxu1 %vm459_vm0, %v430_v21  ;;  %2520 = vmatmul.msk.bf16.gmra.mxu0 %vm459_vm0, %v428_v24  ;;  %1177 = vst [vmem:[#allocation1] ss:$9 sm:$0xff] %v1175_v53  ;;  %v2609_v60 = vld [vmem:[%s3853_s3 + $0x90] sm:$0xf]  ;;  %v2546_v61 = vor.u32 %v2791_v59, %v2545_v58  ;;  %v2807_v62 = vld [vmem:[%s3853_s3 + $0x94] sm:$0xf0] }
  0x2e   : > { %1112 = vmatpush.bf16.msra.mxu1 %v2646_v36  ;;  %v2562_v36 = vor.u32 %v2795_v35, %v2561_v34  ;;  %v2547_v0 = vld [vmem:[%s3853_s3 + $0x18] sm:$0xf0]  ;;  %v2610_v1 = vor.u32 %v2807_v62, %v2609_v60  ;;  %v2804_v3 = vld [vmem:[%s3853_s3 + $0x84] sm:$0xf]  ;;  %v2603_v4 = vld [vmem:[%s3853_s3 + $0x88] sm:$0xf0] }
  0x2f   : > { %2525 = vmatmul.msk.bf16.gmra.mxu2 %vm459_vm0, %v3266_v45  ;;  %v2550_v2 = vor.u32 %v2790_v63, %v2547_v0  ;;  %v2537_v5 = vld [vmem:[%s3853_s3] sm:$0xf]  ;;  %v2606_v6 = vor.u32 %v2804_v3, %v2603_v4  ;;  %v2789_v7 = vld [vmem:[%s3853_s3 + $0x4] sm:$0xf0]  ;;  %v2539_v14 = vld [vmem:[%s3853_s3 + $0x8] sm:$0xf0] }
  0x30   : > { %966 = vmatpush.bf16.msrb.mxu2 %v2570_v26  ;;  %v2601_v8 = vld [vmem:[%s3853_s3 + $0x80] sm:$0xf]  ;;  %v2805_v9 = vld [vmem:[%s3853_s3 + $0x84] sm:$0xf0]  ;;  %v2538_v10 = vor.u32 %v2789_v7, %v2537_v5  ;;  %v605_v23 = vperm.slane %v603_v19, 0  ;;  %v2835_v37 = vld [vmem:[%s3855_s5 + $0x78] sm:$0xff] }
  0x31   : > { %v2834_v62 = vld [vmem:[%s3855_s5 + $0x70] sm:$0xff] }
  0x32   : > { %1113 = vmatpush.bf16.msra.mxu1 %v2638_v42 }
  0x34   : > { %967 = vmatpush.bf16.msrb.mxu2 %v2562_v36  ;;  %v2827_v36 = vld [vmem:[%s3855_s5 + $0x38] sm:$0xff] }
  0x36   : > { %1114 = vmatpush.bf16.msra.mxu1 %v2630_v48  ;;  %v2792_v48 = vld [vmem:[%s3853_s3 + $0x24] sm:$0xf] }
  0x37   : > { %v2558_v56 = vor.u32 %v2792_v48, %v2555_v49 }
  0x38   : > { %968 = vmatpush.bf16.msrb.mxu2 %v2554_v46 }
  0x3a   : > { %1115 = vmatpush.bf16.msra.mxu1 %v2622_v54 }
  0x3c   : > { %969 = vmatpush.bf16.msrb.mxu2 %v2546_v61  ;;  %v2826_v61 = vld [vmem:[%s3855_s5 + $0x30] sm:$0xff] }
  0x3d   : > { %2523 = vmatmul.msk.bf16.gmra.mxu1 %vm459_vm0, %v431_v27 }
  0x40   : > { %970 = vmatpush.bf16.msrb.mxu2 %v2538_v10 }
  0x44   : > { %1476 = vmatpush.bf16.msra.mxu2 %v2827_v36 }
  0x48   : > { %1477 = vmatpush.bf16.msra.mxu2 %v2826_v61 }
  0x4d   : > { %2527 = vmatmul.msk.bf16.vlgmr.msrb.gmra.mxu1 %vm459_vm0, %v427_v18  ;;  %v2815_v18 = vld [vmem:[%s3853_s3 + $0xd4] sm:$0xf0] }
  0x4e   : > { %v2642_v20 = vor.u32 %v2815_v18, %v2641_v17 }
  0x50   : > { %1014 = vmatpush.bf16.msrb.mxu3 %v2642_v20  ;;  %v606_v20 = vpack.i.b16 %v602_v52, %v602_v52 }
  0x5d   : > { %2528 = vmatmul.msk.bf16.gmra.mxu1 %vm459_vm0, %v428_v24 }
  0x6d   : > { %2529 = vmatmul.msk.bf16.gmra.mxu1 %vm459_vm0, %v429_v15  ;;  %v2614_v15 = vor.u32 %v2806_v12, %v2611_v13  ;;  %v2602_v12 = vor.u32 %v2805_v9, %v2601_v8  ;;  %v2788_v13 = vld [vmem:[%s3853_s3 + $0x4] sm:$0xf] }
  0x6e   : > { %v2542_v16 = vor.u32 %v2788_v13, %v2539_v14 }
  0x6f   : > { %1116 = vmatpush.bf16.msra.mxu1 %v2614_v15 }
  0x73   : > { %1117 = vmatpush.bf16.msra.mxu1 %v2606_v6 }
  0x7d   : > { %2530 = vmatmul.msk.bf16.gmra.mxu1 %vm459_vm0, %v430_v21  ;;  %v2798_v21 = vld [vmem:[%s3853_s3 + $0x54] sm:$0xf] }
  0x7e   : > { %v2582_v24 = vor.u32 %v2798_v21, %v2579_v22 }
  0x80   : > { %1063 = vmatpush.bf16.msrb.mxu0 %v2582_v24  ;;  %v608_v24 = vperm.slane %v606_v20, 0  ;;  %v2825_v20 = vld [vmem:[%s3855_s5 + $0x28] sm:$0xff] }
  0x81   : > { %1478 = vmatpush.bf16.msra.mxu2 %v2825_v20  ;;  %v2822_v20 = vld [vmem:[%s3855_s5 + $0x10] sm:$0xff] }
  0x82   : > { %v3470_v29 = vunpack.c.l.bf16 %v608_v24 }
  0x84   : > { %1064 = vmatpush.bf16.msrb.mxu0 %v2574_v32 }
  0x8d   : > { %2531 = vmatmul.msk.bf16.gmra.mxu1 %vm459_vm0, %v431_v27  ;;  %v2633_v27 = vld [vmem:[%s3853_s3 + $0xc0] sm:$0xf] }
  0x8e   : > { %v2634_v30 = vor.u32 %v2813_v28, %v2633_v27  ;;  %v3468_v28 = vunpack.c.l.bf16 %v605_v23 }
  0x90   : > { %1015 = vmatpush.bf16.msrb.mxu3 %v2634_v30 }
  0x94   : > { %1016 = vmatpush.bf16.msrb.mxu3 %v2626_v40 }
  0x9a   : > { %v3289_v55 = vpop.f32.mrf.mxu1  ;;  %v493_v18 = vpop.f32.mrf.mxu0 }
  0x9d   : > { %2532 = vmatmul.msk.bf16.gmra.mxu1 %vm459_vm0, %v432_v39  ;;  %v2794_v39 = vld [vmem:[%s3853_s3 + $0x34] sm:$0xf] }
  0x9e   : > { %v2566_v42 = vor.u32 %v2794_v39, %v2563_v41 }
  0xa0   : > { %1065 = vmatpush.bf16.msrb.mxu0 %v2566_v42 }
  0xa2   : > { %v3331_v11 = vpop.f32.mrf.mxu1  ;;  %v495_v25 = vpop.f32.mrf.mxu0 }
  0xa4   : > { %1066 = vmatpush.bf16.msrb.mxu0 %v2558_v56 }
  0xa8   : > { %1067 = vmatpush.bf16.msrb.mxu0 %v2550_v2 }
  0xaa   : > { %v3375_v33 = vpop.f32.mrf.mxu1  ;;  %v498_v40 = vpop.f32.mrf.mxu0 }
  0xac   : > { %1068 = vmatpush.bf16.msrb.mxu0 %v2542_v16 }
  0xad   : > { %2533 = vmatmul.msk.bf16.gmra.mxu1 %vm459_vm0, %v3266_v45  ;;  %v2617_v45 = vld [vmem:[%s3853_s3 + $0xa0] sm:$0xf] }
  0xae   : > { %v2618_v54 = vor.u32 %v2809_v47, %v2617_v45 }
  0xb0   : > { %1017 = vmatpush.bf16.msrb.mxu3 %v2618_v54 }
  0xb2   : > { %v3418_v57 = vpop.f32.mrf.mxu1  ;;  %v500_v52 = vpop.f32.mrf.mxu0 }
  0xb4   : > { %1018 = vmatpush.bf16.msrb.mxu3 %v2610_v1 }
  0xb8   : > { %1019 = vmatpush.bf16.msrb.mxu3 %v2602_v12 }
  0xba   : > { %v3462_v15 = vpop.f32.mrf.mxu1 }
  0xbc   : > { %1525 = vmatpush.bf16.msra.mxu3 %v2835_v37 }
  0xbd   : > { %2534 = vmatmul.msk.bf16.gmra.mxu1 %vm459_vm0, %v3279_v51 }
  0xc0   : > { %1526 = vmatpush.bf16.msra.mxu3 %v2834_v62  ;;  %v2831_v62 = vld [vmem:[%s3855_s5 + $0x58] sm:$0xff] }
  0xc2   : > { %v3466_v17 = vpop.f32.mrf.mxu1 }
  0xca   : > { %v542_v21 = vpop.f32.mrf.mxu1 }
  0xcb   : > { %v582_v22 = vpack.c.bf16 %v542_v21, %v493_v18 }
  0xcd   : > { %v609_v26 = vunpack.c.l.bf16 %v582_v22  ;;  %v610_v27 = vunpack.c.h.bf16 %v582_v22 }
  0xcf   : > { %v643_v51 = vadd.f32 %v3468_v28, %v609_v26  ;;  %v644_v32 = vadd.f32 %v3470_v29, %v610_v27 }
  0xd1   : > { %v723_v41 = vmax.f32 %v643_v51, 0.0  ;;  %v724_v42 = vmax.f32 %v644_v32, 0.0 }
  0xd2   : > { %v544_v30 = vpop.f32.mrf.mxu1 }
  0xd3   : > { %v583_v31 = vpack.c.bf16 %v544_v30, %v495_v25 }
  0xd5   : > { %v611_v34 = vunpack.c.l.bf16 %v583_v31  ;;  %v612_v35 = vunpack.c.h.bf16 %v583_v31 }
  0xd7   : > { %v645_v38 = vadd.f32 %v3468_v28, %v611_v34  ;;  %v646_v39 = vadd.f32 %v3470_v29, %v612_v35 }
  0xd9   : > { %v725_v43 = vmax.f32 %v645_v38, 0.0  ;;  %v726_v44 = vmax.f32 %v646_v39, 0.0 }
  0xda   : > { %v547_v45 = vpop.f32.mrf.mxu1 }
  0xdb   : > { %v755_v46 = vpack.c.bf16 %v725_v43, %v723_v41  ;;  %v756_v47 = vpack.c.bf16 %v726_v44, %v724_v42  ;;  %v584_v48 = vpack.c.bf16 %v547_v45, %v498_v40  ;;  %v2824_v40 = vld [vmem:[%s3855_s5 + $0x20] sm:$0xff] }
  0xdc   : > { %1479 = vmatpush.bf16.msra.mxu2 %v2824_v40 }
  0xdd   : > { %971 = vmatmul.bf16.vlgmr.msrb.gmra.mxu2 %v755_v46  ;;  %1020 = vmatmul.bf16.vlgmr.msrb.gmra.mxu3 %v756_v47  ;;  %v613_v49 = vunpack.c.l.bf16 %v584_v48  ;;  %v614_v50 = vunpack.c.h.bf16 %v584_v48 }
  0xde   : > { %1069 = vmatmul.bf16.vlgmr.msrb.gmra.mxu0 %v755_v46  ;;  %1118 = vmatmul.bf16.vlgmr.msra.gmra.mxu1 %v756_v47 }
  0xdf   : > { %v647_v59 = vadd.f32 %v3468_v28, %v613_v49  ;;  %v648_v60 = vadd.f32 %v3470_v29, %v614_v50 }
  0xe1   : > { %v727_v1 = vmax.f32 %v647_v59, 0.0  ;;  %v728_v3 = vmax.f32 %v648_v60, 0.0 }
  0xe2   : > { %v549_v53 = vpop.f32.mrf.mxu1 }
  0xe3   : > { %v585_v54 = vpack.c.bf16 %v549_v53, %v500_v52 }
  0xe5   : > { %v615_v56 = vunpack.c.l.bf16 %v585_v54  ;;  %v616_v58 = vunpack.c.h.bf16 %v585_v54 }
  0xe7   : > { %v649_v63 = vadd.f32 %v3468_v28, %v615_v56  ;;  %v650_v0 = vadd.f32 %v3470_v29, %v616_v58  ;;  %v518_v56 = vpop.f32.mrf.mxu2 }
  0xe9   : > { %v729_v2 = vmax.f32 %v649_v63, 0.0  ;;  %v730_v4 = vmax.f32 %v650_v0, 0.0 }
  0xea   : > { %v552_v5 = vpop.f32.mrf.mxu1 }
  0xeb   : > { %v757_v6 = vpack.c.bf16 %v729_v2, %v727_v1  ;;  %v758_v7 = vpack.c.bf16 %v730_v4, %v728_v3  ;;  %v586_v8 = vpack.c.bf16 %v552_v5, %v3289_v55  ;;  %v2833_v55 = vld [vmem:[%s3855_s5 + $0x68] sm:$0xff] }
  0xec   : > { %1527 = vmatpush.bf16.msra.mxu3 %v2833_v55  ;;  %v2830_v55 = vld [vmem:[%s3855_s5 + $0x50] sm:$0xff] }
  0xed   : > { %976 = vmatmul.bf16.gmra.mxu2 %v757_v6  ;;  %1025 = vmatmul.bf16.gmra.mxu3 %v758_v7  ;;  %v617_v9 = vunpack.c.l.bf16 %v586_v8  ;;  %v618_v10 = vunpack.c.h.bf16 %v586_v8 }
  0xee   : > { %1074 = vmatmul.bf16.gmra.mxu0 %v757_v6  ;;  %1123 = vmatmul.bf16.gmra.mxu1 %v758_v7 }
  0xef   : > { %v651_v18 = vadd.f32 %v3468_v28, %v617_v9  ;;  %v652_v19 = vadd.f32 %v3470_v29, %v618_v10  ;;  %v520_v8 = vpop.f32.mrf.mxu2 }
  0xf1   : > { %v732_v24 = vmax.f32 %v652_v19, 0.0 }
  0xf2   : > { %v554_v12 = vpop.f32.mrf.mxu1 }
  0xf3   : > { %v587_v13 = vpack.c.bf16 %v554_v12, %v3331_v11  ;;  %v731_v11 = vmax.f32 %v651_v18, 0.0 }
  0xf5   : > { %v619_v14 = vunpack.c.l.bf16 %v587_v13  ;;  %v620_v16 = vunpack.c.h.bf16 %v587_v13 }
  0xf7   : > { %v653_v21 = vadd.f32 %v3468_v28, %v619_v14  ;;  %v654_v22 = vadd.f32 %v3470_v29, %v620_v16 }
  0xf9   : > { %v733_v23 = vmax.f32 %v653_v21, 0.0  ;;  %v734_v25 = vmax.f32 %v654_v22, 0.0 }
  0xfa   : > { %v557_v26 = vpop.f32.mrf.mxu1 }
  0xfb   : > { %v759_v27 = vpack.c.bf16 %v733_v23, %v731_v11  ;;  %v760_v30 = vpack.c.bf16 %v734_v25, %v732_v24  ;;  %v588_v31 = vpack.c.bf16 %v557_v26, %v3375_v33  ;;  %v2832_v33 = vld [vmem:[%s3855_s5 + $0x60] sm:$0xff]  ;;  %v523_v11 = vpop.f32.mrf.mxu2 }
  0xfc   : > { %1528 = vmatpush.bf16.msra.mxu3 %v2832_v33 }
  0xfd   : > { %981 = vmatmul.bf16.gmra.mxu2 %v759_v27  ;;  %1030 = vmatmul.bf16.gmra.mxu3 %v760_v30  ;;  %v621_v51 = vunpack.c.l.bf16 %v588_v31  ;;  %v622_v32 = vunpack.c.h.bf16 %v588_v31 }
  0xfe   : > { %1079 = vmatmul.bf16.gmra.mxu0 %v759_v27  ;;  %1128 = vmatmul.bf16.gmra.mxu1 %v760_v30 }
  0xff   : > { %v655_v38 = vadd.f32 %v3468_v28, %v621_v51  ;;  %v656_v39 = vadd.f32 %v3470_v29, %v622_v32  ;;  %v2821_v32 = vld [vmem:[%s3855_s5 + $0x8] sm:$0xff] }
 0x100   : > { %1529 = vmatpush.bf16.msra.mxu3 %v2831_v62 }
 0x101   : > { %v736_v44 = vmax.f32 %v656_v39, 0.0 }
 0x102   : > { %v559_v34 = vpop.f32.mrf.mxu1 }
 0x103   : > { %v589_v35 = vpack.c.bf16 %v559_v34, %v3418_v57  ;;  %v735_v57 = vmax.f32 %v655_v38, 0.0  ;;  %v2829_v34 = vld [vmem:[%s3855_s5 + $0x48] sm:$0xff] }
 0x104   : > { %1530 = vmatpush.bf16.msra.mxu3 %v2830_v55 }
 0x105   : > { %v623_v36 = vunpack.c.l.bf16 %v589_v35  ;;  %v624_v37 = vunpack.c.h.bf16 %v589_v35 }
 0x107   : > { %v657_v41 = vadd.f32 %v3468_v28, %v623_v36  ;;  %v658_v42 = vadd.f32 %v3470_v29, %v624_v37  ;;  %v525_v37 = vpop.f32.mrf.mxu2 }
 0x108   : > { %1531 = vmatpush.bf16.msra.mxu3 %v2829_v34 }
 0x109   : > { %v737_v43 = vmax.f32 %v657_v41, 0.0  ;;  %v738_v45 = vmax.f32 %v658_v42, 0.0 }
 0x10a   : > { %v562_v46 = vpop.f32.mrf.mxu1 }
 0x10b   : > { %v761_v47 = vpack.c.bf16 %v737_v43, %v735_v57  ;;  %v762_v48 = vpack.c.bf16 %v738_v45, %v736_v44  ;;  %v590_v49 = vpack.c.bf16 %v562_v46, %v3462_v15  ;;  %v2823_v15 = vld [vmem:[%s3855_s5 + $0x18] sm:$0xff]  ;;  %v528_v44 = vpop.f32.mrf.mxu3 }
 0x10c   : > { %1480 = vmatpush.bf16.msra.mxu2 %v2823_v15 }
 0x10d   : > { %986 = vmatmul.bf16.gmra.mxu2 %v761_v47  ;;  %1035 = vmatmul.bf16.gmra.mxu3 %v762_v48  ;;  %v625_v50 = vunpack.c.l.bf16 %v590_v49  ;;  %v626_v52 = vunpack.c.h.bf16 %v590_v49 }
 0x10e   : > { %1084 = vmatmul.bf16.gmra.mxu0 %v761_v47  ;;  %1133 = vmatmul.bf16.gmra.mxu1 %v762_v48 }
 0x10f   : > { %v659_v60 = vadd.f32 %v3468_v28, %v625_v50  ;;  %v660_v61 = vadd.f32 %v3470_v29, %v626_v52 }
 0x110   : > { %1481 = vmatpush.bf16.msra.mxu2 %v2822_v20 }
 0x111   : > { %v740_v2 = vmax.f32 %v660_v61, 0.0 }
 0x112   : > { %v564_v53 = vpop.f32.mrf.mxu1 }
 0x113   : > { %v591_v54 = vpack.c.bf16 %v564_v53, %v3466_v17  ;;  %v739_v17 = vmax.f32 %v659_v60, 0.0 }
 0x114   : > { %1482 = vmatpush.bf16.msra.mxu2 %v2821_v32 }
 0x115   : > { %v627_v58 = vunpack.c.l.bf16 %v591_v54  ;;  %v628_v59 = vunpack.c.h.bf16 %v591_v54 }
 0x117   : > { %v661_v63 = vadd.f32 %v3468_v28, %v627_v58  ;;  %v662_v0 = vadd.f32 %v3470_v29, %v628_v59  ;;  %v530_v58 = vpop.f32.mrf.mxu3 }
 0x119   : > { %v741_v1 = vmax.f32 %v661_v63, 0.0  ;;  %v742_v3 = vmax.f32 %v662_v0, 0.0 }
 0x11a   : > { %v567_v4 = vpop.f32.mrf.mxu1 }
 0x11b   : > { %v763_v5 = vpack.c.bf16 %v741_v1, %v739_v17  ;;  %v764_v6 = vpack.c.bf16 %v742_v3, %v740_v2  ;;  %v592_v7 = vpack.c.bf16 %v567_v4, %v518_v56 }
 0x11d   : > { %991 = vmatmul.bf16.gmra.mxu2 %v763_v5  ;;  %1040 = vmatmul.bf16.gmra.mxu3 %v764_v6  ;;  %v629_v9 = vunpack.c.l.bf16 %v592_v7  ;;  %v630_v10 = vunpack.c.h.bf16 %v592_v7 }
 0x11e   : > { %1089 = vmatmul.bf16.gmra.mxu0 %v763_v5  ;;  %1138 = vmatmul.bf16.gmra.mxu1 %v764_v6  ;;  %v2820_v5 = vld [vmem:[%s3855_s5] sm:$0xff] }
 0x11f   : > { %v663_v18 = vadd.f32 %v3468_v28, %v629_v9  ;;  %v664_v19 = vadd.f32 %v3470_v29, %v630_v10  ;;  %v2828_v6 = vld [vmem:[%s3855_s5 + $0x40] sm:$0xff]  ;;  %1483 = vmatpush.bf16.msra.mxu2 %v2820_v5  ;;  %v1179_v10 = vld [vmem:[#allocation1 + $0x9] sm:$0xff] }
 0x120   : > { %1532 = vmatpush.bf16.msra.mxu3 %v2828_v6  ;;  %v1178_v9 = vld [vmem:[#allocation1] sm:$0xff] }
 0x121   : > { %v743_v23 = vmax.f32 %v663_v18, 0.0  ;;  %v744_v25 = vmax.f32 %v664_v19, 0.0  ;;  %v1183_v18 = vpack.i.b16 %v1179_v10, %v1179_v10 }
 0x122   : > { %v569_v12 = vpop.f32.mrf.mxu1 }
 0x123   : > { %v593_v13 = vpack.c.bf16 %v569_v12, %v520_v8 }
 0x125   : > { %v631_v14 = vunpack.c.l.bf16 %v593_v13  ;;  %v632_v16 = vunpack.c.h.bf16 %v593_v13 }
 0x127   : > { %v665_v21 = vadd.f32 %v3468_v28, %v631_v14  ;;  %v666_v22 = vadd.f32 %v3470_v29, %v632_v16  ;;  %v1180_v14 = vpack.i.b16 %v1178_v9, %v1178_v9 }
 0x129   : > { %v745_v24 = vmax.f32 %v665_v21, 0.0  ;;  %v746_v26 = vmax.f32 %v666_v22, 0.0  ;;  %v1182_v22 = vperm.slane %v1180_v14, 0 }
 0x12a   : > { %v572_v27 = vpop.f32.mrf.mxu1 }
 0x12b   : > { %v765_v30 = vpack.c.bf16 %v745_v24, %v743_v23  ;;  %v766_v31 = vpack.c.bf16 %v746_v26, %v744_v25  ;;  %v594_v51 = vpack.c.bf16 %v572_v27, %v523_v11  ;;  %v1185_v11 = vperm.slane %v1183_v18, 0 }
 0x12c   : > { %v3558_v24 = vunpack.c.l.bf16 %v1182_v22 }
 0x12d   : > { %996 = vmatmul.bf16.gmra.mxu2 %v765_v30  ;;  %1045 = vmatmul.bf16.gmra.mxu3 %v766_v31  ;;  %v633_v35 = vunpack.c.l.bf16 %v594_v51  ;;  %v634_v36 = vunpack.c.h.bf16 %v594_v51 }
 0x12e   : > { %1094 = vmatmul.bf16.gmra.mxu0 %v765_v30  ;;  %1143 = vmatmul.bf16.gmra.mxu1 %v766_v31  ;;  %v3560_v30 = vunpack.c.l.bf16 %v1185_v11 }
 0x12f   : > { %v667_v41 = vadd.f32 %v3468_v28, %v633_v35  ;;  %v668_v42 = vadd.f32 %v3470_v29, %v634_v36 }
 0x131   : > { %v747_v45 = vmax.f32 %v667_v41, 0.0  ;;  %v748_v47 = vmax.f32 %v668_v42, 0.0 }
 0x132   : > { %v574_v38 = vpop.f32.mrf.mxu1 }
 0x133   : > { %v595_v39 = vpack.c.bf16 %v574_v38, %v525_v37 }
 0x135   : > { %v635_v40 = vunpack.c.l.bf16 %v595_v39  ;;  %v636_v33 = vunpack.c.h.bf16 %v595_v39 }
 0x137   : > { %v669_v57 = vadd.f32 %v3468_v28, %v635_v40  ;;  %v670_v43 = vadd.f32 %v3470_v29, %v636_v33  ;;  %v2839_v40 = vld [vmem:[%s3857_s7 + $0x18] sm:$0xff] }
 0x138   : > { %1749 = vmatpush.bf16.msra.mxu0 %v2839_v40 }
 0x139   : > { %v749_v46 = vmax.f32 %v669_v57, 0.0  ;;  %v750_v48 = vmax.f32 %v670_v43, 0.0 }
 0x13a   : > { %v577_v49 = vpop.f32.mrf.mxu1 }
 0x13b   : > { %v767_v50 = vpack.c.bf16 %v749_v46, %v747_v45  ;;  %v768_v52 = vpack.c.bf16 %v750_v48, %v748_v47  ;;  %v596_v53 = vpack.c.bf16 %v577_v49, %v528_v44 }
 0x13d   : > { %1001 = vmatmul.bf16.gmra.mxu2 %v767_v50  ;;  %1050 = vmatmul.bf16.gmra.mxu3 %v768_v52  ;;  %v637_v54 = vunpack.c.l.bf16 %v596_v53  ;;  %v638_v56 = vunpack.c.h.bf16 %v596_v53 }
 0x13e   : > { %1099 = vmatmul.bf16.gmra.mxu0 %v767_v50  ;;  %1148 = vmatmul.bf16.gmra.mxu1 %v768_v52 }
 0x13f   : > { %v671_v62 = vadd.f32 %v3468_v28, %v637_v54  ;;  %v672_v63 = vadd.f32 %v3470_v29, %v638_v56 }
 0x141   : > { %v751_v1 = vmax.f32 %v671_v62, 0.0  ;;  %v752_v3 = vmax.f32 %v672_v63, 0.0 }
 0x142   : > { %v579_v59 = vpop.f32.mrf.mxu1 }
 0x143   : > { %v597_v60 = vpack.c.bf16 %v579_v59, %v530_v58 }
 0x145   : > { %v639_v61 = vunpack.c.l.bf16 %v597_v60  ;;  %v640_v15 = vunpack.c.h.bf16 %v597_v60 }
 0x147   : > { %v673_v0 = vadd.f32 %v3468_v28, %v639_v61  ;;  %v674_v17 = vadd.f32 %v3470_v29, %v640_v15 }
 0x149   : > { %v753_v2 = vmax.f32 %v673_v0, 0.0  ;;  %v754_v4 = vmax.f32 %v674_v17, 0.0 }
 0x14b   : > { %v769_v7 = vpack.c.bf16 %v753_v2, %v751_v1  ;;  %v770_v8 = vpack.c.bf16 %v754_v4, %v752_v3 }
 0x14d   : > { %1006 = vmatmul.bf16.gmra.mxu2 %v769_v7  ;;  %1055 = vmatmul.bf16.gmra.mxu3 %v770_v8 }
 0x14e   : > { %1104 = vmatmul.bf16.gmra.mxu0 %v769_v7  ;;  %1153 = vmatmul.bf16.gmra.mxu1 %v770_v8 }
 0x15b   : > { %v1070_v28 = vpop.f32.mrf.mxu0  ;;  %v1119_v29 = vpop.f32.mrf.mxu1 }
 0x15c   : > { %v1120_v19 = vadd.f32 %v1119_v29, %v1070_v28 }
 0x160   : > { %v972_v12 = vpop.f32.mrf.mxu2  ;;  %v1021_v13 = vpop.f32.mrf.mxu3 }
 0x161   : > { %v1022_v16 = vadd.f32 %v1021_v13, %v972_v12 }
 0x163   : > { %v1072_v20 = vpop.f32.mrf.mxu0  ;;  %v1121_v55 = vpop.f32.mrf.mxu1  ;;  %v1159_v21 = vpack.c.bf16 %v1120_v19, %v1022_v16 }
 0x164   : > { %v1122_v31 = vadd.f32 %v1121_v55, %v1072_v20 }
 0x165   : > { %v1186_v23 = vunpack.c.l.bf16 %v1159_v21  ;;  %v1187_v27 = vunpack.c.h.bf16 %v1159_v21 }
 0x167   : > { %v1220_v36 = vadd.f32 %v3558_v24, %v1186_v23  ;;  %v1221_v37 = vadd.f32 %v3560_v30, %v1187_v27 }
 0x168   : > { %v974_v25 = vpop.f32.mrf.mxu2  ;;  %v1023_v26 = vpop.f32.mrf.mxu3 }
 0x169   : > { %v1024_v51 = vadd.f32 %v1023_v26, %v974_v25  ;;  %v1300_v42 = vmax.f32 %v1220_v36, 0.0  ;;  %v1301_v44 = vmax.f32 %v1221_v37, 0.0 }
 0x16b   : > { %v1160_v32 = vpack.c.bf16 %v1122_v31, %v1024_v51  ;;  %v1075_v34 = vpop.f32.mrf.mxu0  ;;  %v1124_v35 = vpop.f32.mrf.mxu1 }
 0x16c   : > { %v1125_v48 = vadd.f32 %v1124_v35, %v1075_v34  ;;  %v2838_v35 = vld [vmem:[%s3857_s7 + $0x10] sm:$0xff] }
 0x16d   : > { %v1188_v38 = vunpack.c.l.bf16 %v1160_v32  ;;  %v1189_v39 = vunpack.c.h.bf16 %v1160_v32  ;;  %1750 = vmatpush.bf16.msra.mxu0 %v2838_v35 }
 0x16f   : > { %v1222_v33 = vadd.f32 %v3558_v24, %v1188_v38  ;;  %v1223_v41 = vadd.f32 %v3560_v30, %v1189_v39 }
 0x170   : > { %v977_v57 = vpop.f32.mrf.mxu2  ;;  %v1026_v43 = vpop.f32.mrf.mxu3 }
 0x171   : > { %v1302_v45 = vmax.f32 %v1222_v33, 0.0  ;;  %v1303_v46 = vmax.f32 %v1223_v41, 0.0  ;;  %v1027_v47 = vadd.f32 %v1026_v43, %v977_v57 }
 0x173   : > { %v1077_v49 = vpop.f32.mrf.mxu0  ;;  %v1126_v50 = vpop.f32.mrf.mxu1  ;;  %v1332_v52 = vpack.c.bf16 %v1302_v45, %v1300_v42  ;;  %v1333_v53 = vpack.c.bf16 %v1303_v46, %v1301_v44  ;;  %v1161_v54 = vpack.c.bf16 %v1125_v48, %v1027_v47 }
 0x174   : > { %v1127_v61 = vadd.f32 %v1126_v50, %v1077_v49 }
 0x175   : > { %1484 = vmatmul.bf16.vlgmr.msra.gmra.mxu2 %v1332_v52  ;;  %1533 = vmatmul.bf16.vlgmr.msra.gmra.mxu3 %v1333_v53  ;;  %v1190_v56 = vunpack.c.l.bf16 %v1161_v54  ;;  %v1191_v60 = vunpack.c.h.bf16 %v1161_v54 }
 0x177   : > { %v1224_v17 = vadd.f32 %v3558_v24, %v1190_v56  ;;  %v1225_v3 = vadd.f32 %v3560_v30, %v1191_v60 }
 0x178   : > { %v979_v58 = vpop.f32.mrf.mxu2  ;;  %v1028_v59 = vpop.f32.mrf.mxu3 }
 0x179   : > { %v1029_v15 = vadd.f32 %v1028_v59, %v979_v58  ;;  %v1304_v8 = vmax.f32 %v1224_v17, 0.0  ;;  %v1305_v9 = vmax.f32 %v1225_v3, 0.0 }
 0x17b   : > { %v1162_v62 = vpack.c.bf16 %v1127_v61, %v1029_v15  ;;  %v1080_v63 = vpop.f32.mrf.mxu0  ;;  %v1129_v0 = vpop.f32.mrf.mxu1 }
 0x17c   : > { %v1130_v12 = vadd.f32 %v1129_v0, %v1080_v63 }
 0x17d   : > { %v1192_v1 = vunpack.c.l.bf16 %v1162_v62  ;;  %v1193_v2 = vunpack.c.h.bf16 %v1162_v62 }
 0x17f   : > { %v1226_v4 = vadd.f32 %v3558_v24, %v1192_v1  ;;  %v1227_v5 = vadd.f32 %v3560_v30, %v1193_v2 }
 0x180   : > { %v982_v6 = vpop.f32.mrf.mxu2  ;;  %v1031_v7 = vpop.f32.mrf.mxu3 }
 0x181   : > { %v1032_v28 = vadd.f32 %v1031_v7, %v982_v6  ;;  %v1306_v29 = vmax.f32 %v1226_v4, 0.0  ;;  %v1307_v10 = vmax.f32 %v1227_v5, 0.0 }
 0x183   : > { %v1082_v13 = vpop.f32.mrf.mxu0  ;;  %v1131_v14 = vpop.f32.mrf.mxu1  ;;  %v1334_v16 = vpack.c.bf16 %v1306_v29, %v1304_v8  ;;  %v1335_v18 = vpack.c.bf16 %v1307_v10, %v1305_v9  ;;  %v1163_v19 = vpack.c.bf16 %v1130_v12, %v1032_v28 }
 0x184   : > { %v1132_v11 = vadd.f32 %v1131_v14, %v1082_v13 }
 0x185   : > { %1489 = vmatmul.bf16.gmra.mxu2 %v1334_v16  ;;  %1538 = vmatmul.bf16.gmra.mxu3 %v1335_v18  ;;  %v1194_v20 = vunpack.c.l.bf16 %v1163_v19  ;;  %v1195_v22 = vunpack.c.h.bf16 %v1163_v19 }
 0x187   : > { %v1228_v31 = vadd.f32 %v3558_v24, %v1194_v20  ;;  %v1229_v34 = vadd.f32 %v3560_v30, %v1195_v22 }
 0x188   : > { %v984_v55 = vpop.f32.mrf.mxu2  ;;  %v1033_v21 = vpop.f32.mrf.mxu3 }
 0x189   : > { %v1034_v23 = vadd.f32 %v1033_v21, %v984_v55  ;;  %v1308_v40 = vmax.f32 %v1228_v31, 0.0  ;;  %v1309_v42 = vmax.f32 %v1229_v34, 0.0 }
 0x18b   : > { %v1164_v25 = vpack.c.bf16 %v1132_v11, %v1034_v23  ;;  %v1085_v26 = vpop.f32.mrf.mxu0  ;;  %v1134_v27 = vpop.f32.mrf.mxu1 }
 0x18c   : > { %v1135_v43 = vadd.f32 %v1134_v27, %v1085_v26  ;;  %v2837_v27 = vld [vmem:[%s3857_s7 + $0x8] sm:$0xff] }
 0x18d   : > { %v1196_v51 = vunpack.c.l.bf16 %v1164_v25  ;;  %v1197_v32 = vunpack.c.h.bf16 %v1164_v25  ;;  %1751 = vmatpush.bf16.msra.mxu0 %v2837_v27 }
 0x18f   : > { %v1230_v36 = vadd.f32 %v3558_v24, %v1196_v51  ;;  %v1231_v37 = vadd.f32 %v3560_v30, %v1197_v32 }
 0x190   : > { %v987_v38 = vpop.f32.mrf.mxu2  ;;  %v1036_v39 = vpop.f32.mrf.mxu3 }
 0x191   : > { %v1037_v33 = vadd.f32 %v1036_v39, %v987_v38  ;;  %v1310_v41 = vmax.f32 %v1230_v36, 0.0  ;;  %v1311_v57 = vmax.f32 %v1231_v37, 0.0 }
 0x193   : > { %v1087_v44 = vpop.f32.mrf.mxu0  ;;  %v1136_v45 = vpop.f32.mrf.mxu1  ;;  %v1336_v46 = vpack.c.bf16 %v1310_v41, %v1308_v40  ;;  %v1337_v47 = vpack.c.bf16 %v1311_v57, %v1309_v42  ;;  %v1165_v48 = vpack.c.bf16 %v1135_v43, %v1037_v33 }
 0x194   : > { %v1137_v54 = vadd.f32 %v1136_v45, %v1087_v44 }
 0x195   : > { %1494 = vmatmul.bf16.gmra.mxu2 %v1336_v46  ;;  %1543 = vmatmul.bf16.gmra.mxu3 %v1337_v47  ;;  %v1198_v49 = vunpack.c.l.bf16 %v1165_v48  ;;  %v1199_v53 = vunpack.c.h.bf16 %v1165_v48 }
 0x197   : > { %v1232_v61 = vadd.f32 %v3558_v24, %v1198_v49  ;;  %v1233_v63 = vadd.f32 %v3560_v30, %v1199_v53 }
 0x198   : > { %v989_v50 = vpop.f32.mrf.mxu2  ;;  %v1038_v52 = vpop.f32.mrf.mxu3 }
 0x199   : > { %v1039_v56 = vadd.f32 %v1038_v52, %v989_v50  ;;  %v1312_v3 = vmax.f32 %v1232_v61, 0.0  ;;  %v1313_v6 = vmax.f32 %v1233_v63, 0.0 }
 0x19b   : > { %v1166_v58 = vpack.c.bf16 %v1137_v54, %v1039_v56  ;;  %v1090_v59 = vpop.f32.mrf.mxu0  ;;  %v1139_v60 = vpop.f32.mrf.mxu1 }
 0x19c   : > { %v1140_v8 = vadd.f32 %v1139_v60, %v1090_v59 }
 0x19d   : > { %v1200_v15 = vunpack.c.l.bf16 %v1166_v58  ;;  %v1201_v62 = vunpack.c.h.bf16 %v1166_v58 }
 0x19f   : > { %v1234_v0 = vadd.f32 %v3558_v24, %v1200_v15  ;;  %v1235_v17 = vadd.f32 %v3560_v30, %v1201_v62 }
 0x1a0   : > { %v992_v1 = vpop.f32.mrf.mxu2  ;;  %v1041_v2 = vpop.f32.mrf.mxu3 }
 0x1a1   : > { %v1042_v4 = vadd.f32 %v1041_v2, %v992_v1  ;;  %v1314_v5 = vmax.f32 %v1234_v0, 0.0  ;;  %v1315_v7 = vmax.f32 %v1235_v17, 0.0 }
 0x1a3   : > { %v1092_v28 = vpop.f32.mrf.mxu0  ;;  %v1141_v29 = vpop.f32.mrf.mxu1  ;;  %v1338_v9 = vpack.c.bf16 %v1314_v5, %v1312_v3  ;;  %v1339_v10 = vpack.c.bf16 %v1315_v7, %v1313_v6  ;;  %v1167_v12 = vpack.c.bf16 %v1140_v8, %v1042_v4 }
 0x1a4   : > { %v1142_v19 = vadd.f32 %v1141_v29, %v1092_v28  ;;  %v2836_v28 = vld [vmem:[%s3857_s7] sm:$0xff] }
 0x1a5   : > { %1499 = vmatmul.bf16.gmra.mxu2 %v1338_v9  ;;  %1548 = vmatmul.bf16.gmra.mxu3 %v1339_v10  ;;  %v1202_v13 = vunpack.c.l.bf16 %v1167_v12  ;;  %v1203_v18 = vunpack.c.h.bf16 %v1167_v12 }
 0x1a6   : > { %1752 = vmatpush.bf16.msra.mxu0 %v2836_v28 }
 0x1a7   : > { %v1236_v11 = vadd.f32 %v3558_v24, %v1202_v13  ;;  %v1237_v26 = vadd.f32 %v3560_v30, %v1203_v18 }
 0x1a8   : > { %v994_v14 = vpop.f32.mrf.mxu2  ;;  %v1043_v16 = vpop.f32.mrf.mxu3 }
 0x1a9   : > { %v1044_v20 = vadd.f32 %v1043_v16, %v994_v14  ;;  %v1316_v35 = vmax.f32 %v1236_v11, 0.0  ;;  %v1317_v38 = vmax.f32 %v1237_v26, 0.0 }
 0x1ab   : > { %v1168_v55 = vpack.c.bf16 %v1142_v19, %v1044_v20  ;;  %v1095_v21 = vpop.f32.mrf.mxu0  ;;  %v1144_v22 = vpop.f32.mrf.mxu1 }
 0x1ac   : > { %v1145_v40 = vadd.f32 %v1144_v22, %v1095_v21 }
 0x1ad   : > { %v1204_v23 = vunpack.c.l.bf16 %v1168_v55  ;;  %v1205_v25 = vunpack.c.h.bf16 %v1168_v55 }
 0x1af   : > { %v1238_v31 = vadd.f32 %v3558_v24, %v1204_v23  ;;  %v1239_v51 = vadd.f32 %v3560_v30, %v1205_v25 }
 0x1b0   : > { %v997_v32 = vpop.f32.mrf.mxu2  ;;  %v1046_v34 = vpop.f32.mrf.mxu3 }
 0x1b1   : > { %v1047_v36 = vadd.f32 %v1046_v34, %v997_v32  ;;  %v1318_v37 = vmax.f32 %v1238_v31, 0.0  ;;  %v1319_v39 = vmax.f32 %v1239_v51, 0.0 }
 0x1b3   : > { %v1097_v33 = vpop.f32.mrf.mxu0  ;;  %v1146_v41 = vpop.f32.mrf.mxu1  ;;  %v1340_v42 = vpack.c.bf16 %v1318_v37, %v1316_v35  ;;  %v1341_v57 = vpack.c.bf16 %v1319_v39, %v1317_v38  ;;  %v1169_v43 = vpack.c.bf16 %v1145_v40, %v1047_v36 }
 0x1b4   : > { %v1147_v48 = vadd.f32 %v1146_v41, %v1097_v33 }
 0x1b5   : > { %1504 = vmatmul.bf16.gmra.mxu2 %v1340_v42  ;;  %1553 = vmatmul.bf16.gmra.mxu3 %v1341_v57  ;;  %v1206_v44 = vunpack.c.l.bf16 %v1169_v43  ;;  %v1207_v47 = vunpack.c.h.bf16 %v1169_v43 }
 0x1b7   : > { %v1240_v54 = vadd.f32 %v3558_v24, %v1206_v44  ;;  %v1241_v59 = vadd.f32 %v3560_v30, %v1207_v47 }
 0x1b8   : > { %v999_v45 = vpop.f32.mrf.mxu2  ;;  %v1048_v46 = vpop.f32.mrf.mxu3 }
 0x1b9   : > { %v1049_v49 = vadd.f32 %v1048_v46, %v999_v45  ;;  %v1320_v63 = vmax.f32 %v1240_v54, 0.0  ;;  %v1321_v1 = vmax.f32 %v1241_v59, 0.0 }
 0x1bb   : > { %v1170_v50 = vpack.c.bf16 %v1147_v48, %v1049_v49  ;;  %v1100_v52 = vpop.f32.mrf.mxu0  ;;  %v1149_v53 = vpop.f32.mrf.mxu1 }
 0x1bc   : > { %v1150_v3 = vadd.f32 %v1149_v53, %v1100_v52 }
 0x1bd   : > { %v1208_v56 = vunpack.c.l.bf16 %v1170_v50  ;;  %v1209_v58 = vunpack.c.h.bf16 %v1170_v50 }
 0x1bf   : > { %v1242_v60 = vadd.f32 %v3558_v24, %v1208_v56  ;;  %v1243_v61 = vadd.f32 %v3560_v30, %v1209_v58 }
 0x1c0   : > { %v1002_v15 = vpop.f32.mrf.mxu2  ;;  %v1051_v62 = vpop.f32.mrf.mxu3 }
 0x1c1   : > { %v1052_v0 = vadd.f32 %v1051_v62, %v1002_v15  ;;  %v1322_v17 = vmax.f32 %v1242_v60, 0.0  ;;  %v1323_v2 = vmax.f32 %v1243_v61, 0.0  ;;  %v1590_v61 = vld [vmem:[%s3856_s6] sm:$0x1] }
 0x1c3   : > { %v1102_v4 = vpop.f32.mrf.mxu0  ;;  %v1151_v5 = vpop.f32.mrf.mxu1  ;;  %v1342_v6 = vpack.c.bf16 %v1322_v17, %v1320_v63  ;;  %v1343_v7 = vpack.c.bf16 %v1323_v2, %v1321_v1  ;;  %v1171_v8 = vpack.c.bf16 %v1150_v3, %v1052_v0  ;;  %v1592_v0 = vpack.i.b16 %v1590_v61, %v1590_v61 }
 0x1c4   : > { %v1152_v13 = vadd.f32 %v1151_v5, %v1102_v4 }
 0x1c5   : > { %1509 = vmatmul.bf16.gmra.mxu2 %v1342_v6  ;;  %1558 = vmatmul.bf16.gmra.mxu3 %v1343_v7  ;;  %v1210_v29 = vunpack.c.l.bf16 %v1171_v8  ;;  %v1211_v12 = vunpack.c.h.bf16 %v1171_v8 }
 0x1c7   : > { %v1244_v20 = vadd.f32 %v3558_v24, %v1210_v29  ;;  %v1245_v22 = vadd.f32 %v3560_v30, %v1211_v12 }
 0x1c8   : > { %v1004_v9 = vpop.f32.mrf.mxu2  ;;  %v1053_v10 = vpop.f32.mrf.mxu3 }
 0x1c9   : > { %v1054_v14 = vadd.f32 %v1053_v10, %v1004_v9  ;;  %v1324_v27 = vmax.f32 %v1244_v20, 0.0  ;;  %v1325_v32 = vmax.f32 %v1245_v22, 0.0 }
 0x1cb   : > { %v1172_v16 = vpack.c.bf16 %v1152_v13, %v1054_v14  ;;  %v1105_v18 = vpop.f32.mrf.mxu0  ;;  %v1154_v19 = vpop.f32.mrf.mxu1 }
 0x1cc   : > { %v1155_v35 = vadd.f32 %v1154_v19, %v1105_v18 }
 0x1cd   : > { %v1212_v55 = vunpack.c.l.bf16 %v1172_v16  ;;  %v1213_v21 = vunpack.c.h.bf16 %v1172_v16 }
 0x1cf   : > { %v1246_v11 = vadd.f32 %v3558_v24, %v1212_v55  ;;  %v1247_v23 = vadd.f32 %v3560_v30, %v1213_v21 }
 0x1d0   : > { %v1007_v25 = vpop.f32.mrf.mxu2  ;;  %v1056_v26 = vpop.f32.mrf.mxu3 }
 0x1d1   : > { %v1057_v31 = vadd.f32 %v1056_v26, %v1007_v25  ;;  %v1326_v51 = vmax.f32 %v1246_v11, 0.0  ;;  %v1327_v34 = vmax.f32 %v1247_v23, 0.0 }
 0x1d3   : > { %v1344_v36 = vpack.c.bf16 %v1326_v51, %v1324_v27  ;;  %v1345_v37 = vpack.c.bf16 %v1327_v34, %v1325_v32  ;;  %v1173_v38 = vpack.c.bf16 %v1155_v35, %v1057_v31  ;;  %v1107_v39 = vpop.f32.mrf.mxu0  ;;  %v1156_v40 = vpop.f32.mrf.mxu1 }
 0x1d4   : > { %v1157_v43 = vadd.f32 %v1156_v40, %v1107_v39 }
 0x1d5   : > { %1514 = vmatmul.bf16.gmra.mxu2 %v1344_v36  ;;  %1563 = vmatmul.bf16.gmra.mxu3 %v1345_v37  ;;  %v1214_v42 = vunpack.c.l.bf16 %v1173_v38  ;;  %v1215_v57 = vunpack.c.h.bf16 %v1173_v38 }
 0x1d7   : > { %v1248_v48 = vadd.f32 %v3558_v24, %v1214_v42  ;;  %v1249_v49 = vadd.f32 %v3560_v30, %v1215_v57 }
 0x1d8   : > { %v1009_v33 = vpop.f32.mrf.mxu2  ;;  %v1058_v41 = vpop.f32.mrf.mxu3 }
 0x1d9   : > { %v1059_v44 = vadd.f32 %v1058_v41, %v1009_v33  ;;  %v1328_v53 = vmax.f32 %v1248_v48, 0.0  ;;  %v1329_v56 = vmax.f32 %v1249_v49, 0.0 }
 0x1db   : > { %v1174_v45 = vpack.c.bf16 %v1157_v43, %v1059_v44 }
 0x1dd   : > { %v1216_v46 = vunpack.c.l.bf16 %v1174_v45  ;;  %v1217_v47 = vunpack.c.h.bf16 %v1174_v45 }
 0x1df   : > { %v1250_v50 = vadd.f32 %v3558_v24, %v1216_v46  ;;  %v1251_v52 = vadd.f32 %v3560_v30, %v1217_v47  ;;  %v1594_v24 = vperm.slane %v1592_v0, 0 }
 0x1e1   : > { %v1330_v54 = vmax.f32 %v1250_v50, 0.0  ;;  %v1331_v58 = vmax.f32 %v1251_v52, 0.0  ;;  %v3609_v3 = vunpack.c.l.bf16 %v1594_v24 }
 0x1e3   : > { %v1346_v59 = vpack.c.bf16 %v1330_v54, %v1328_v53  ;;  %v1347_v60 = vpack.c.bf16 %v1331_v58, %v1329_v56 }
 0x1e5   : > { %1519 = vmatmul.bf16.gmra.mxu2 %v1346_v59  ;;  %1568 = vmatmul.bf16.gmra.mxu3 %v1347_v60 }
 0x1f8   : > { %v1485_v15 = vpop.f32.mrf.mxu2  ;;  %v1534_v62 = vpop.f32.mrf.mxu3 }
 0x1f9   : > { %v1535_v63 = vadd.f32 %v1534_v62, %v1485_v15 }
 0x1fb   : > { %v1574_v17 = vpack.c.bf16 %v1535_v63, %v1535_v63 }
 0x1fd   : > { %v1595_v2 = vunpack.c.l.bf16 %v1574_v17 }
 0x1ff   : > { %v1612_v6 = vadd.f32 %v3609_v3, %v1595_v2 }
 0x200   : > { %v1487_v1 = vpop.f32.mrf.mxu2  ;;  %v1536_v30 = vpop.f32.mrf.mxu3 }
 0x201   : > { %v1537_v4 = vadd.f32 %v1536_v30, %v1487_v1  ;;  %v1660_v9 = vmax.f32 %v1612_v6, 0.0 }
 0x203   : > { %v1575_v5 = vpack.c.bf16 %v1537_v4, %v1537_v4 }
 0x205   : > { %v1596_v7 = vunpack.c.l.bf16 %v1575_v5 }
 0x207   : > { %v1613_v8 = vadd.f32 %v3609_v3, %v1596_v7 }
 0x208   : > { %v1490_v28 = vpop.f32.mrf.mxu2  ;;  %v1539_v29 = vpop.f32.mrf.mxu3 }
 0x209   : > { %v1661_v10 = vmax.f32 %v1613_v8, 0.0  ;;  %v1540_v12 = vadd.f32 %v1539_v29, %v1490_v28 }
 0x20b   : > { %v1676_v13 = vpack.c.bf16 %v1661_v10, %v1660_v9  ;;  %v1576_v14 = vpack.c.bf16 %v1540_v12, %v1540_v12 }
 0x20d   : > { %2743 = vmatmul.msk.bf16.vlgmr.msra.gmra.mxu0 %vm1720_vm1, %v1676_v13  ;;  %v1597_v19 = vunpack.c.l.bf16 %v1576_v14 }
 0x20f   : > { %v1614_v21 = vadd.f32 %v3609_v3, %v1597_v19 }
 0x210   : > { %v1492_v16 = vpop.f32.mrf.mxu2  ;;  %v1541_v18 = vpop.f32.mrf.mxu3 }
 0x211   : > { %v1542_v20 = vadd.f32 %v1541_v18, %v1492_v16  ;;  %v1662_v26 = vmax.f32 %v1614_v21, 0.0 }
 0x213   : > { %v1577_v55 = vpack.c.bf16 %v1542_v20, %v1542_v20 }
 0x215   : > { %v1598_v22 = vunpack.c.l.bf16 %v1577_v55 }
 0x217   : > { %v1615_v11 = vadd.f32 %v3609_v3, %v1598_v22 }
 0x218   : > { %v1495_v23 = vpop.f32.mrf.mxu2  ;;  %v1544_v25 = vpop.f32.mrf.mxu3 }
 0x219   : > { %v1663_v27 = vmax.f32 %v1615_v11, 0.0  ;;  %v1545_v31 = vadd.f32 %v1544_v25, %v1495_v23 }
 0x21b   : > { %v1677_v51 = vpack.c.bf16 %v1663_v27, %v1662_v26  ;;  %v1578_v32 = vpack.c.bf16 %v1545_v31, %v1545_v31 }
 0x21d   : > { %2744 = vmatmul.msk.bf16.gmra.mxu0 %vm1720_vm1, %v1677_v51  ;;  %v1599_v36 = vunpack.c.l.bf16 %v1578_v32 }
 0x21f   : > { %v1616_v39 = vadd.f32 %v3609_v3, %v1599_v36 }
 0x220   : > { %v1497_v34 = vpop.f32.mrf.mxu2  ;;  %v1546_v35 = vpop.f32.mrf.mxu3 }
 0x221   : > { %v1547_v37 = vadd.f32 %v1546_v35, %v1497_v34  ;;  %v1664_v57 = vmax.f32 %v1616_v39, 0.0 }
 0x223   : > { %v1579_v38 = vpack.c.bf16 %v1547_v37, %v1547_v37 }
 0x225   : > { %v1600_v40 = vunpack.c.l.bf16 %v1579_v38 }
 0x227   : > { %v1617_v33 = vadd.f32 %v3609_v3, %v1600_v40 }
 0x228   : > { %v1500_v41 = vpop.f32.mrf.mxu2  ;;  %v1549_v42 = vpop.f32.mrf.mxu3 }
 0x229   : > { %v1665_v43 = vmax.f32 %v1617_v33, 0.0  ;;  %v1550_v44 = vadd.f32 %v1549_v42, %v1500_v41 }
 0x22b   : > { %v1678_v45 = vpack.c.bf16 %v1665_v43, %v1664_v57  ;;  %v1580_v46 = vpack.c.bf16 %v1550_v44, %v1550_v44 }
 0x22d   : > { %2745 = vmatmul.msk.bf16.gmra.mxu0 %vm1720_vm1, %v1678_v45  ;;  %v1601_v49 = vunpack.c.l.bf16 %v1580_v46 }
 0x22f   : > { %v1618_v53 = vadd.f32 %v3609_v3, %v1601_v49 }
 0x230   : > { %v1502_v47 = vpop.f32.mrf.mxu2  ;;  %v1551_v48 = vpop.f32.mrf.mxu3 }
 0x231   : > { %v1552_v50 = vadd.f32 %v1551_v48, %v1502_v47  ;;  %v1666_v60 = vmax.f32 %v1618_v53, 0.0 }
 0x233   : > { %v1581_v52 = vpack.c.bf16 %v1552_v50, %v1552_v50 }
 0x235   : > { %v1602_v54 = vunpack.c.l.bf16 %v1581_v52 }
 0x237   : > { %v1619_v56 = vadd.f32 %v3609_v3, %v1602_v54 }
 0x238   : > { %v1505_v58 = vpop.f32.mrf.mxu2  ;;  %v1554_v59 = vpop.f32.mrf.mxu3 }
 0x239   : > { %v1667_v61 = vmax.f32 %v1619_v56, 0.0  ;;  %v1555_v15 = vadd.f32 %v1554_v59, %v1505_v58  ;;  %v3638_v58 = vld [vmem:[%s3858_s8] ss:$0 sm:$0xff] }
 0x23b   : > { %v1679_v62 = vpack.c.bf16 %v1667_v61, %v1666_v60  ;;  %v1582_v63 = vpack.c.bf16 %v1555_v15, %v1555_v15  ;;  %v3644_v61 = vld [vmem:[%s3859_s9] ss:$0 sm:$0xff] }
 0x23d   : > { %2746 = vmatmul.msk.bf16.gmra.mxu0 %vm1720_vm1, %v1679_v62  ;;  %v1603_v24 = vunpack.c.l.bf16 %v1582_v63 }
 0x23f   : > { %v1620_v2 = vadd.f32 %v3609_v3, %v1603_v24 }
 0x240   : > { %v1507_v0 = vpop.f32.mrf.mxu2  ;;  %v1556_v17 = vpop.f32.mrf.mxu3 }
 0x241   : > { %v1557_v1 = vadd.f32 %v1556_v17, %v1507_v0  ;;  %v1668_v8 = vmax.f32 %v1620_v2, 0.0 }
 0x243   : > { %v1583_v30 = vpack.c.bf16 %v1557_v1, %v1557_v1 }
 0x245   : > { %v1604_v4 = vunpack.c.l.bf16 %v1583_v30 }
 0x247   : > { %v1621_v5 = vadd.f32 %v3609_v3, %v1604_v4 }
 0x248   : > { %v1510_v6 = vpop.f32.mrf.mxu2  ;;  %v1559_v7 = vpop.f32.mrf.mxu3 }
 0x249   : > { %v1669_v28 = vmax.f32 %v1621_v5, 0.0  ;;  %v1560_v29 = vadd.f32 %v1559_v7, %v1510_v6 }
 0x24b   : > { %v1680_v9 = vpack.c.bf16 %v1669_v28, %v1668_v8  ;;  %v1584_v10 = vpack.c.bf16 %v1560_v29, %v1560_v29 }
 0x24d   : > { %2747 = vmatmul.msk.bf16.gmra.mxu0 %vm1720_vm1, %v1680_v9  ;;  %v1605_v14 = vunpack.c.l.bf16 %v1584_v10 }
 0x24f   : > { %v1622_v19 = vadd.f32 %v3609_v3, %v1605_v14 }
 0x250   : > { %v1512_v12 = vpop.f32.mrf.mxu2  ;;  %v1561_v13 = vpop.f32.mrf.mxu3 }
 0x251   : > { %v1562_v16 = vadd.f32 %v1561_v13, %v1512_v12  ;;  %v1670_v11 = vmax.f32 %v1622_v19, 0.0 }
 0x253   : > { %v1585_v18 = vpack.c.bf16 %v1562_v16, %v1562_v16 }
 0x255   : > { %v1606_v20 = vunpack.c.l.bf16 %v1585_v18 }
 0x257   : > { %v1623_v55 = vadd.f32 %v3609_v3, %v1606_v20 }
 0x258   : > { %v1515_v21 = vpop.f32.mrf.mxu2  ;;  %v1564_v22 = vpop.f32.mrf.mxu3 }
 0x259   : > { %v1671_v23 = vmax.f32 %v1623_v55, 0.0  ;;  %v1565_v25 = vadd.f32 %v1564_v22, %v1515_v21 }
 0x25b   : > { %v1681_v26 = vpack.c.bf16 %v1671_v23, %v1670_v11  ;;  %v1586_v27 = vpack.c.bf16 %v1565_v25, %v1565_v25 }
 0x25d   : > { %2748 = vmatmul.msk.bf16.gmra.mxu0 %vm1720_vm1, %v1681_v26  ;;  %v1607_v32 = vunpack.c.l.bf16 %v1586_v27 }
 0x25f   : > { %v1624_v36 = vadd.f32 %v3609_v3, %v1607_v32 }
 0x260   : > { %v1517_v31 = vpop.f32.mrf.mxu2  ;;  %v1566_v51 = vpop.f32.mrf.mxu3 }
 0x261   : > { %v1567_v34 = vadd.f32 %v1566_v51, %v1517_v31  ;;  %v1672_v33 = vmax.f32 %v1624_v36, 0.0 }
 0x263   : > { %v1587_v35 = vpack.c.bf16 %v1567_v34, %v1567_v34 }
 0x265   : > { %v1608_v37 = vunpack.c.l.bf16 %v1587_v35 }
 0x267   : > { %v1625_v38 = vadd.f32 %v3609_v3, %v1608_v37 }
 0x268   : > { %v1520_v39 = vpop.f32.mrf.mxu2  ;;  %v1569_v40 = vpop.f32.mrf.mxu3 }
 0x269   : > { %v1673_v41 = vmax.f32 %v1625_v38, 0.0  ;;  %v1570_v42 = vadd.f32 %v1569_v40, %v1520_v39 }
 0x26b   : > { %v1682_v57 = vpack.c.bf16 %v1673_v41, %v1672_v33  ;;  %v1588_v43 = vpack.c.bf16 %v1570_v42, %v1570_v42 }
 0x26d   : > { %2749 = vmatmul.msk.bf16.gmra.mxu0 %vm1720_vm1, %v1682_v57  ;;  %v1609_v46 = vunpack.c.l.bf16 %v1588_v43 }
 0x26f   : > { %v1626_v49 = vadd.f32 %v3609_v3, %v1609_v46 }
 0x270   : > { %v1522_v44 = vpop.f32.mrf.mxu2  ;;  %v1571_v45 = vpop.f32.mrf.mxu3 }
 0x271   : > { %v1572_v47 = vadd.f32 %v1571_v45, %v1522_v44  ;;  %v1674_v53 = vmax.f32 %v1626_v49, 0.0 }
 0x273   : > { %v1589_v48 = vpack.c.bf16 %v1572_v47, %v1572_v47 }
 0x275   : > { %v1610_v50 = vunpack.c.l.bf16 %v1589_v48 }
 0x277   : > { %v1627_v52 = vadd.f32 %v3609_v3, %v1610_v50 }
 0x279   : > { %v1675_v54 = vmax.f32 %v1627_v52, 0.0 }
 0x27b   : > { %v1683_v56 = vpack.c.bf16 %v1675_v54, %v1674_v53 }
 0x27d   : > { %2750 = vmatmul.msk.bf16.gmra.mxu0 %vm1720_vm1, %v1683_v56 }
 0x28a   : > { %v1754_v59 = vpop.f32.mrf.mxu0 }
 0x28b   : > { %v1755_v60 = vadd.f32 %v3638_v58, %v1754_v59 }
 0x28d   : > { %v1794_v15 = vmax.f32 %v1755_v60, 0.0 }
 0x28f   : > { %v1814_v3 = vmul.f32 %v3644_v61, %v1794_v15 }
 0x291   : > { %v1831_v62 = vsel %vm1830_vm2, %v1814_v3, 0.0 }
 0x292   : > { %v1756_v63 = vpop.f32.mrf.mxu0  ;;  %1832 = vadd.xlane.f32.xlu0 %v1831_v62 }
 0x293   : > { %v1757_v0 = vadd.f32 %v3638_v58, %v1756_v63 }
 0x295   : > { %v1795_v17 = vmax.f32 %v1757_v0, 0.0 }
 0x297   : > { %v1815_v24 = vmul.f32 %v3644_v61, %v1795_v17 }
 0x299   : > { %v1834_v1 = vsel %vm1830_vm2, %v1815_v24, 0.0 }
 0x29a   : > { %1835 = vadd.xlane.f32.xlu0 %v1834_v1  ;;  %v1759_v30 = vpop.f32.mrf.mxu0 }
 0x29b   : > { %v1760_v2 = vadd.f32 %v3638_v58, %v1759_v30 }
 0x29d   : > { %v1796_v4 = vmax.f32 %v1760_v2, 0.0 }
 0x29f   : > { %v1816_v5 = vmul.f32 %v3644_v61, %v1796_v4 }
 0x2a1   : > { %v1837_v6 = vsel %vm1830_vm2, %v1816_v5, 0.0 }
 0x2a2   : > { %v1761_v7 = vpop.f32.mrf.mxu0  ;;  %1838 = vadd.xlane.f32.xlu1 %v1837_v6  ;;  %v3690_v6 = vld [vmem:[#allocation2] ss:$0 sm:$0xff] }
 0x2a3   : > { %v1762_v8 = vadd.f32 %v3638_v58, %v1761_v7 }
 0x2a5   : > { %v1797_v28 = vmax.f32 %v1762_v8, 0.0 }
 0x2a7   : > { %v1817_v29 = vmul.f32 %v3644_v61, %v1797_v28 }
 0x2a9   : > { %v1840_v9 = vsel %vm1830_vm2, %v1817_v29, 0.0 }
 0x2aa   : > { %1841 = vadd.xlane.f32.xlu1 %v1840_v9  ;;  %v1764_v10 = vpop.f32.mrf.mxu0 }
 0x2ab   : > { %v1765_v12 = vadd.f32 %v3638_v58, %v1764_v10 }
 0x2ad   : > { %v1798_v13 = vmax.f32 %v1765_v12, 0.0 }
 0x2af   : > { %v1818_v14 = vmul.f32 %v3644_v61, %v1798_v13 }
 0x2b1   : > { %v1843_v16 = vsel %vm1830_vm2, %v1818_v14, 0.0 }
 0x2b2   : > { %v1766_v18 = vpop.f32.mrf.mxu0  ;;  %1844 = vadd.xlane.f32.xlu2 %v1843_v16 }
 0x2b3   : > { %v1767_v19 = vadd.f32 %v3638_v58, %v1766_v18 }
 0x2b5   : > { %v1799_v20 = vmax.f32 %v1767_v19, 0.0 }
 0x2b7   : > { %v1819_v55 = vmul.f32 %v3644_v61, %v1799_v20 }
 0x2b9   : > { %v1846_v21 = vsel %vm1830_vm2, %v1819_v55, 0.0 }
 0x2ba   : > { %1847 = vadd.xlane.f32.xlu2 %v1846_v21  ;;  %v1769_v22 = vpop.f32.mrf.mxu0 }
 0x2bb   : > { %v1770_v11 = vadd.f32 %v3638_v58, %v1769_v22 }
 0x2bd   : > { %v1800_v23 = vmax.f32 %v1770_v11, 0.0 }
 0x2bf   : > { %v1820_v25 = vmul.f32 %v3644_v61, %v1800_v23 }
 0x2c1   : > { %v1849_v26 = vsel %vm1830_vm2, %v1820_v25, 0.0 }
 0x2c2   : > { %v1771_v27 = vpop.f32.mrf.mxu0  ;;  %1850 = vadd.xlane.f32.xlu0 %v1849_v26 }
 0x2c3   : > { %v1772_v31 = vadd.f32 %v3638_v58, %v1771_v27 }
 0x2c5   : > { %v1801_v51 = vmax.f32 %v1772_v31, 0.0 }
 0x2c7   : > { %v1821_v32 = vmul.f32 %v3644_v61, %v1801_v51 }
 0x2c9   : > { %v1852_v34 = vsel %vm1830_vm2, %v1821_v32, 0.0 }
 0x2ca   : > { %1853 = vadd.xlane.f32.xlu1 %v1852_v34  ;;  %v1774_v35 = vpop.f32.mrf.mxu0 }
 0x2cb   : > { %v1775_v36 = vadd.f32 %v3638_v58, %v1774_v35 }
 0x2cd   : > { %v1802_v37 = vmax.f32 %v1775_v36, 0.0 }
 0x2cf   : > { %v1822_v38 = vmul.f32 %v3644_v61, %v1802_v37 }
 0x2d1   : > { %v1855_v39 = vsel %vm1830_vm2, %v1822_v38, 0.0 }
 0x2d2   : > { %v1776_v40 = vpop.f32.mrf.mxu0  ;;  %1856 = vadd.xlane.f32.xlu2 %v1855_v39 }
 0x2d3   : > { %v1777_v33 = vadd.f32 %v3638_v58, %v1776_v40 }
 0x2d5   : > { %v1803_v41 = vmax.f32 %v1777_v33, 0.0 }
 0x2d7   : > { %v1823_v42 = vmul.f32 %v3644_v61, %v1803_v41 }
 0x2d9   : > { %v1858_v57 = vsel %vm1830_vm2, %v1823_v42, 0.0 }
 0x2da   : > { %1859 = vadd.xlane.f32.xlu0 %v1858_v57  ;;  %v1779_v43 = vpop.f32.mrf.mxu0 }
 0x2db   : > { %v1780_v44 = vadd.f32 %v3638_v58, %v1779_v43 }
 0x2dd   : > { %v1804_v45 = vmax.f32 %v1780_v44, 0.0 }
 0x2df   : > { %v1824_v46 = vmul.f32 %v3644_v61, %v1804_v45 }
 0x2e1   : > { %v1861_v47 = vsel %vm1830_vm2, %v1824_v46, 0.0 }
 0x2e2   : > { %v1781_v48 = vpop.f32.mrf.mxu0  ;;  %1862 = vadd.xlane.f32.xlu1 %v1861_v47 }
 0x2e3   : > { %v1782_v49 = vadd.f32 %v3638_v58, %v1781_v48 }
 0x2e5   : > { %v1805_v50 = vmax.f32 %v1782_v49, 0.0 }
 0x2e7   : > { %v1825_v52 = vmul.f32 %v3644_v61, %v1805_v50 }
 0x2e9   : > { %v1864_v53 = vsel %vm1830_vm2, %v1825_v52, 0.0 }
 0x2ea   : > { %1865 = vadd.xlane.f32.xlu2 %v1864_v53  ;;  %v1784_v54 = vpop.f32.mrf.mxu0 }
 0x2eb   : > { %v1785_v56 = vadd.f32 %v3638_v58, %v1784_v54 }
 0x2ed   : > { %v1806_v59 = vmax.f32 %v1785_v56, 0.0 }
 0x2ef   : > { %v1826_v60 = vmul.f32 %v3644_v61, %v1806_v59 }
 0x2f1   : > { %v1867_v15 = vsel %vm1830_vm2, %v1826_v60, 0.0 }
 0x2f2   : > { %v1786_v3 = vpop.f32.mrf.mxu0  ;;  %1868 = vadd.xlane.f32.xlu0 %v1867_v15 }
 0x2f3   : > { %v1787_v62 = vadd.f32 %v3638_v58, %v1786_v3 }
 0x2f5   : > { %v1807_v63 = vmax.f32 %v1787_v62, 0.0 }
 0x2f7   : > { %v1827_v0 = vmul.f32 %v3644_v61, %v1807_v63 }
 0x2f9   : > { %v1870_v17 = vsel %vm1830_vm2, %v1827_v0, 0.0 }
 0x2fa   : > { %1871 = vadd.xlane.f32.xlu1 %v1870_v17  ;;  %v1789_v24 = vpop.f32.mrf.mxu0 }
 0x2fb   : > { %v1790_v1 = vadd.f32 %v3638_v58, %v1789_v24 }
 0x2fd   : > { %v1808_v30 = vmax.f32 %v1790_v1, 0.0 }
 0x2ff   : > { %v1828_v2 = vmul.f32 %v3644_v61, %v1808_v30 }
 0x301   : > { %v1873_v4 = vsel %vm1830_vm2, %v1828_v2, 0.0 }
 0x302   : > { %v1791_v5 = vpop.f32.mrf.mxu0  ;;  %1874 = vadd.xlane.f32.xlu2 %v1873_v4 }
 0x303   : > { %v1792_v7 = vadd.f32 %v3638_v58, %v1791_v5 }
 0x305   : > { %v1809_v8 = vmax.f32 %v1792_v7, 0.0  ;;  %v1833_v28 = vpop.xlane.xlu0 %1832 }
 0x306   : > { %v1883_v29 = vadd.f32 %v3690_v6, %v1833_v28 }
 0x307   : > { %v1829_v9 = vmul.f32 %v3644_v61, %v1809_v8 }
 0x308   : > { %v2751_v10 = vmul.f32 -1.442695, %v1883_v29 }
 0x309   : > { %v1876_v12 = vsel %vm1830_vm2, %v1829_v9, 0.0 }
 0x30a   : > { %2940 = vpow2.f32 %v2751_v10  ;;  %1877 = vadd.xlane.f32.xlu0 %v1876_v12 }
 0x30d   : > { %v1836_v13 = vpop.xlane.xlu0 %1835 }
 0x30e   : > { %v1884_v14 = vadd.f32 %v3690_v6, %v1836_v13 }
 0x310   : > { %v2941_v16 = vpop.eup %2940  ;;  %v2752_v18 = vmul.f32 -1.442695, %v1884_v14 }
 0x311   : > { %v1947_v19 = vadd.f32 1.0, %v2941_v16 }
 0x312   : > { %2942 = vpow2.f32 %v2752_v18 }
 0x313   : > { %2944 = vrcp.f32 %v1947_v19  ;;  %v1974_v25 = vand.u32 2147483648, %v1947_v19  ;;  %v1972_v31 = vand.u32 2147483647, %v1947_v19  ;;  %vm1968_vm4 = vweird.f32 %v1947_v19 }
 0x315   : > { %v1839_v58 = vpop.xlane.xlu1 %1838  ;;  %v1975_v37 = vor.u32 1.1754944e-38, %v1974_v25  ;;  %vm1973_vm7 = vcmp.eq.f32.partialorder %v1972_v31, 8.507059e+37 }
 0x316   : > { %v1885_v20 = vadd.f32 %v3690_v6, %v1839_v58 }
 0x318   : > { %v2943_v55 = vpop.eup %2942  ;;  %v2753_v21 = vmul.f32 -1.442695, %v1885_v20 }
 0x319   : > { %v2945_v61 = vpop.eup %2944  ;;  %v1948_v22 = vadd.f32 1.0, %v2943_v55 }
 0x31a   : > { %v1964_v11 = vmul.f32 %v2945_v61, %v1947_v19  ;;  %2946 = vpow2.f32 %v2753_v21  ;;  %vm1969_vm3 = vweird.f32 %v2945_v61 }
 0x31b   : > { %2948 = vrcp.f32 %v1948_v22  ;;  %vm1970_vm6 = vmor %vm1968_vm4, %vm1969_vm3  ;;  %v1989_v42 = vand.u32 2147483648, %v1948_v22  ;;  %v1987_v44 = vand.u32 2147483647, %v1948_v22  ;;  %vm1983_vm9 = vweird.f32 %v1948_v22 }
 0x31c   : > { %v1965_v23 = vsub.f32 1.0, %v1964_v11 }
 0x31d   : > { %v1842_v26 = vpop.xlane.xlu1 %1841  ;;  %v1990_v50 = vor.u32 1.1754944e-38, %v1989_v42  ;;  %vm1988_vm11 = vcmp.eq.f32.partialorder %v1987_v44, 8.507059e+37 }
 0x31e   : > { %v1966_v27 = vmul.f32 %v2945_v61, %v1965_v23  ;;  %v1886_v51 = vadd.f32 %v3690_v6, %v1842_v26 }
 0x320   : > { %v2947_v32 = vpop.eup %2946  ;;  %v1967_v34 = vadd.f32 %v2945_v61, %v1966_v27  ;;  %v2754_v35 = vmul.f32 -1.442695, %v1886_v51 }
 0x321   : > { %v2949_v36 = vpop.eup %2948  ;;  %v1949_v38 = vadd.f32 1.0, %v2947_v32 }
 0x322   : > { %v1971_v39 = vsel %vm1970_vm6, %v2945_v61, %v1967_v34  ;;  %v1979_v40 = vmul.f32 %v2949_v36, %v1948_v22  ;;  %2950 = vpow2.f32 %v2754_v35  ;;  %vm1984_vm8 = vweird.f32 %v2949_v36 }
 0x323   : > { %v1976_v33 = vsel %vm1973_vm7, %v1975_v37, %v1971_v39  ;;  %2952 = vrcp.f32 %v1949_v38  ;;  %vm1985_vm10 = vmor %vm1983_vm9, %vm1984_vm8  ;;  %v2004_v60 = vand.u32 2147483648, %v1949_v38  ;;  %v2002_v62 = vand.u32 2147483647, %v1949_v38 }
 0x324   : > { %2204 = vst.msk [vmem:[%s3700_s19] sm:$0xff] %vm2203_vm5, %v1976_v33  ;;  %v1980_v41 = vsub.f32 1.0, %v1979_v40  ;;  %vm1998_vm13 = vweird.f32 %v1949_v38 }
 0x325   : > { %v1845_v57 = vpop.xlane.xlu2 %1844  ;;  %v2005_v30 = vor.u32 1.1754944e-38, %v2004_v60  ;;  %vm2003_vm15 = vcmp.eq.f32.partialorder %v2002_v62, 8.507059e+37 }
 0x326   : > { %v1981_v43 = vmul.f32 %v2949_v36, %v1980_v41  ;;  %v1887_v45 = vadd.f32 %v3690_v6, %v1845_v57 }
 0x328   : > { %v2951_v46 = vpop.eup %2950  ;;  %v1982_v47 = vadd.f32 %v2949_v36, %v1981_v43  ;;  %v2755_v48 = vmul.f32 -1.442695, %v1887_v45 }
 0x329   : > { %v2953_v49 = vpop.eup %2952  ;;  %v1950_v52 = vadd.f32 1.0, %v2951_v46 }
 0x32a   : > { %v1986_v53 = vsel %vm1985_vm10, %v2949_v36, %v1982_v47  ;;  %v1994_v54 = vmul.f32 %v2953_v49, %v1949_v38  ;;  %2954 = vpow2.f32 %v2755_v48  ;;  %vm1999_vm12 = vweird.f32 %v2953_v49 }
 0x32b   : > { %v1991_v56 = vsel %vm1988_vm11, %v1990_v50, %v1986_v53  ;;  %2956 = vrcp.f32 %v1950_v52  ;;  %vm2000_vm14 = vmor %vm1998_vm13, %vm1999_vm12  ;;  %v2019_v28 = vand.u32 2147483648, %v1950_v52  ;;  %v2017_v10 = vand.u32 2147483647, %v1950_v52 }
 0x32c   : > { %2205 = vst.msk [vmem:[%s3700_s19 + $0x8] sm:$0xff] %vm2203_vm5, %v1991_v56  ;;  %v1995_v59 = vsub.f32 1.0, %v1994_v54  ;;  %vm2013_vm1 = vweird.f32 %v1950_v52 }
 0x32d   : > { %v1848_v15 = vpop.xlane.xlu2 %1847  ;;  %v2020_v19 = vor.u32 1.1754944e-38, %v2019_v28  ;;  %vm2018_vm3 = vcmp.eq.f32.partialorder %v2017_v10, 8.507059e+37 }
 0x32e   : > { %v1996_v3 = vmul.f32 %v2953_v49, %v1995_v59  ;;  %v1888_v63 = vadd.f32 %v3690_v6, %v1848_v15 }
 0x330   : > { %v2955_v0 = vpop.eup %2954  ;;  %v1997_v17 = vadd.f32 %v2953_v49, %v1996_v3  ;;  %v2756_v24 = vmul.f32 -1.442695, %v1888_v63 }
 0x331   : > { %v2957_v1 = vpop.eup %2956  ;;  %v1951_v2 = vadd.f32 1.0, %v2955_v0 }
 0x332   : > { %v2001_v4 = vsel %vm2000_vm14, %v2953_v49, %v1997_v17  ;;  %v2009_v5 = vmul.f32 %v2957_v1, %v1950_v52  ;;  %2958 = vpow2.f32 %v2756_v24  ;;  %vm2014_vm0 = vweird.f32 %v2957_v1 }
 0x333   : > { %v2006_v7 = vsel %vm2003_vm15, %v2005_v30, %v2001_v4  ;;  %2960 = vrcp.f32 %v1951_v2  ;;  %vm2015_vm2 = vmor %vm2013_vm1, %vm2014_vm0  ;;  %v2034_v22 = vand.u32 2147483648, %v1951_v2  ;;  %v2032_v25 = vand.u32 2147483647, %v1951_v2 }
 0x334   : > { %2206 = vst.msk [vmem:[%s3700_s19 + $0x10] sm:$0xff] %vm2203_vm5, %v2006_v7  ;;  %v2010_v8 = vsub.f32 1.0, %v2009_v5  ;;  %vm2028_vm6 = vweird.f32 %v1951_v2 }
 0x335   : > { %v1851_v29 = vpop.xlane.xlu0 %1850  ;;  %v2035_v34 = vor.u32 1.1754944e-38, %v2034_v22  ;;  %vm2033_vm8 = vcmp.eq.f32.partialorder %v2032_v25, 8.507059e+37 }
 0x336   : > { %v2011_v9 = vmul.f32 %v2957_v1, %v2010_v8  ;;  %v1889_v12 = vadd.f32 %v3690_v6, %v1851_v29 }
 0x338   : > { %v2959_v13 = vpop.eup %2958  ;;  %v2012_v14 = vadd.f32 %v2957_v1, %v2011_v9  ;;  %v2757_v16 = vmul.f32 -1.442695, %v1889_v12 }
 0x339   : > { %v2961_v18 = vpop.eup %2960  ;;  %v1952_v58 = vadd.f32 1.0, %v2959_v13 }
 0x33a   : > { %v2016_v20 = vsel %vm2015_vm2, %v2957_v1, %v2012_v14  ;;  %v2024_v55 = vmul.f32 %v2961_v18, %v1951_v2  ;;  %2962 = vpow2.f32 %v2757_v16  ;;  %vm2029_vm4 = vweird.f32 %v2961_v18 }
 0x33b   : > { %v2021_v21 = vsel %vm2018_vm3, %v2020_v19, %v2016_v20  ;;  %2964 = vrcp.f32 %v1952_v58  ;;  %vm2030_vm7 = vmor %vm2028_vm6, %vm2029_vm4  ;;  %v2049_v40 = vand.u32 2147483648, %v1952_v58  ;;  %v2047_v42 = vand.u32 2147483647, %v1952_v58 }
 0x33c   : > { %2207 = vst.msk [vmem:[%s3700_s19 + $0x18] sm:$0xff] %vm2203_vm5, %v2021_v21  ;;  %v2025_v61 = vsub.f32 1.0, %v2024_v55  ;;  %vm2043_vm10 = vweird.f32 %v1952_v58 }
 0x33d   : > { %v1854_v11 = vpop.xlane.xlu1 %1853  ;;  %v2050_v47 = vor.u32 1.1754944e-38, %v2049_v40  ;;  %vm2048_vm12 = vcmp.eq.f32.partialorder %v2047_v42, 8.507059e+37 }
 0x33e   : > { %v2026_v23 = vmul.f32 %v2961_v18, %v2025_v61  ;;  %v1890_v26 = vadd.f32 %v3690_v6, %v1854_v11 }
 0x340   : > { %v2963_v27 = vpop.eup %2962  ;;  %v2027_v31 = vadd.f32 %v2961_v18, %v2026_v23  ;;  %v2758_v51 = vmul.f32 -1.442695, %v1890_v26 }
 0x341   : > { %v2965_v32 = vpop.eup %2964  ;;  %v1953_v35 = vadd.f32 1.0, %v2963_v27 }
 0x342   : > { %v2031_v36 = vsel %vm2030_vm7, %v2961_v18, %v2027_v31  ;;  %v2039_v37 = vmul.f32 %v2965_v32, %v1952_v58  ;;  %2966 = vpow2.f32 %v2758_v51  ;;  %vm2044_vm9 = vweird.f32 %v2965_v32 }
 0x343   : > { %v2036_v38 = vsel %vm2033_vm8, %v2035_v34, %v2031_v36  ;;  %2968 = vrcp.f32 %v1953_v35  ;;  %vm2045_vm11 = vmor %vm2043_vm10, %vm2044_vm9  ;;  %v2064_v54 = vand.u32 2147483648, %v1953_v35  ;;  %v2062_v60 = vand.u32 2147483647, %v1953_v35 }
 0x344   : > { %2208 = vst.msk [vmem:[%s3700_s19 + $0x20] sm:$0xff] %vm2203_vm5, %v2036_v38  ;;  %v2040_v39 = vsub.f32 1.0, %v2039_v37  ;;  %vm2058_vm14 = vweird.f32 %v1953_v35 }
 0x345   : > { %v1857_v33 = vpop.xlane.xlu2 %1856  ;;  %v2065_v17 = vor.u32 1.1754944e-38, %v2064_v54  ;;  %vm2063_vm0 = vcmp.eq.f32.partialorder %v2062_v60, 8.507059e+37 }
 0x346   : > { %v2041_v41 = vmul.f32 %v2965_v32, %v2040_v39  ;;  %v1891_v57 = vadd.f32 %v3690_v6, %v1857_v33 }
 0x348   : > { %v2967_v43 = vpop.eup %2966  ;;  %v2042_v44 = vadd.f32 %v2965_v32, %v2041_v41  ;;  %v2759_v45 = vmul.f32 -1.442695, %v1891_v57 }
 0x349   : > { %v2969_v46 = vpop.eup %2968  ;;  %v1954_v48 = vadd.f32 1.0, %v2967_v43 }
 0x34a   : > { %v2046_v49 = vsel %vm2045_vm11, %v2965_v32, %v2042_v44  ;;  %v2054_v50 = vmul.f32 %v2969_v46, %v1953_v35  ;;  %2970 = vpow2.f32 %v2759_v45  ;;  %vm2059_vm13 = vweird.f32 %v2969_v46 }
 0x34b   : > { %v2051_v52 = vsel %vm2048_vm12, %v2050_v47, %v2046_v49  ;;  %2972 = vrcp.f32 %v1954_v48  ;;  %vm2060_vm15 = vmor %vm2058_vm14, %vm2059_vm13  ;;  %v2079_v5 = vand.u32 2147483648, %v1954_v48  ;;  %v2077_v28 = vand.u32 2147483647, %v1954_v48 }
 0x34c   : > { %2209 = vst.msk [vmem:[%s3700_s19 + $0x28] sm:$0xff] %vm2203_vm5, %v2051_v52  ;;  %v2055_v53 = vsub.f32 1.0, %v2054_v50  ;;  %vm2073_vm2 = vweird.f32 %v1954_v48 }
 0x34d   : > { %v1860_v56 = vpop.xlane.xlu0 %1859  ;;  %v2080_v14 = vor.u32 1.1754944e-38, %v2079_v5  ;;  %vm2078_vm4 = vcmp.eq.f32.partialorder %v2077_v28, 8.507059e+37 }
 0x34e   : > { %v2056_v59 = vmul.f32 %v2969_v46, %v2055_v53  ;;  %v1892_v15 = vadd.f32 %v3690_v6, %v1860_v56 }
 0x350   : > { %v2971_v3 = vpop.eup %2970  ;;  %v2057_v62 = vadd.f32 %v2969_v46, %v2056_v59  ;;  %v2760_v63 = vmul.f32 -1.442695, %v1892_v15 }
 0x351   : > { %v2973_v0 = vpop.eup %2972  ;;  %v1955_v24 = vadd.f32 1.0, %v2971_v3 }
 0x352   : > { %v2061_v1 = vsel %vm2060_vm15, %v2969_v46, %v2057_v62  ;;  %v2069_v30 = vmul.f32 %v2973_v0, %v1954_v48  ;;  %2974 = vpow2.f32 %v2760_v63  ;;  %vm2074_vm1 = vweird.f32 %v2973_v0 }
 0x353   : > { %v2066_v2 = vsel %vm2063_vm0, %v2065_v17, %v2061_v1  ;;  %2976 = vrcp.f32 %v1955_v24  ;;  %vm2075_vm3 = vmor %vm2073_vm2, %vm2074_vm1  ;;  %v2094_v55 = vand.u32 2147483648, %v1955_v24  ;;  %v2092_v22 = vand.u32 2147483647, %v1955_v24 }
 0x354   : > { %2210 = vst.msk [vmem:[%s3700_s19 + $0x30] sm:$0xff] %vm2203_vm5, %v2066_v2  ;;  %v2070_v4 = vsub.f32 1.0, %v2069_v30  ;;  %vm2088_vm7 = vweird.f32 %v1955_v24 }
 0x355   : > { %v1863_v7 = vpop.xlane.xlu1 %1862  ;;  %v2095_v31 = vor.u32 1.1754944e-38, %v2094_v55  ;;  %vm2093_vm9 = vcmp.eq.f32.partialorder %v2092_v22, 8.507059e+37 }
 0x356   : > { %v2071_v8 = vmul.f32 %v2973_v0, %v2070_v4  ;;  %v1893_v29 = vadd.f32 %v3690_v6, %v1863_v7 }
 0x358   : > { %v2975_v9 = vpop.eup %2974  ;;  %v2072_v10 = vadd.f32 %v2973_v0, %v2071_v8  ;;  %v2761_v12 = vmul.f32 -1.442695, %v1893_v29 }
 0x359   : > { %v2977_v13 = vpop.eup %2976  ;;  %v1956_v16 = vadd.f32 1.0, %v2975_v9 }
 0x35a   : > { %v2076_v18 = vsel %vm2075_vm3, %v2973_v0, %v2072_v10  ;;  %v2084_v19 = vmul.f32 %v2977_v13, %v1955_v24  ;;  %2978 = vpow2.f32 %v2761_v12  ;;  %vm2089_vm6 = vweird.f32 %v2977_v13 }
 0x35b   : > { %v2081_v58 = vsel %vm2078_vm4, %v2080_v14, %v2076_v18  ;;  %2980 = vrcp.f32 %v1956_v16  ;;  %vm2090_vm8 = vmor %vm2088_vm7, %vm2089_vm6  ;;  %v2109_v37 = vand.u32 2147483648, %v1956_v16  ;;  %v2107_v40 = vand.u32 2147483647, %v1956_v16 }
 0x35c   : > { %2211 = vst.msk [vmem:[%s3700_s19 + $0x38] sm:$0xff] %vm2203_vm5, %v2081_v58  ;;  %v2085_v20 = vsub.f32 1.0, %v2084_v19  ;;  %vm2103_vm11 = vweird.f32 %v1956_v16 }
 0x35d   : > { %v1866_v21 = vpop.xlane.xlu2 %1865  ;;  %v2110_v44 = vor.u32 1.1754944e-38, %v2109_v37  ;;  %vm2108_vm13 = vcmp.eq.f32.partialorder %v2107_v40, 8.507059e+37 }
 0x35e   : > { %v2086_v61 = vmul.f32 %v2977_v13, %v2085_v20  ;;  %v1894_v11 = vadd.f32 %v3690_v6, %v1866_v21 }
 0x360   : > { %v2979_v23 = vpop.eup %2978  ;;  %v2087_v25 = vadd.f32 %v2977_v13, %v2086_v61  ;;  %v2762_v26 = vmul.f32 -1.442695, %v1894_v11 }
 0x361   : > { %v2981_v27 = vpop.eup %2980  ;;  %v1957_v51 = vadd.f32 1.0, %v2979_v23 }
 0x362   : > { %v2091_v32 = vsel %vm2090_vm8, %v2977_v13, %v2087_v25  ;;  %v2099_v34 = vmul.f32 %v2981_v27, %v1956_v16  ;;  %2982 = vpow2.f32 %v2762_v26  ;;  %vm2104_vm10 = vweird.f32 %v2981_v27 }
 0x363   : > { %v2096_v35 = vsel %vm2093_vm9, %v2095_v31, %v2091_v32  ;;  %2984 = vrcp.f32 %v1957_v51  ;;  %vm2105_vm12 = vmor %vm2103_vm11, %vm2104_vm10  ;;  %v2124_v50 = vand.u32 2147483648, %v1957_v51  ;;  %v2122_v54 = vand.u32 2147483647, %v1957_v51 }
 0x364   : > { %2212 = vst.msk [vmem:[%s3700_s19 + $0x40] sm:$0xff] %vm2203_vm5, %v2096_v35  ;;  %v2100_v36 = vsub.f32 1.0, %v2099_v34  ;;  %vm2118_vm15 = vweird.f32 %v1957_v51 }
 0x365   : > { %v1869_v38 = vpop.xlane.xlu0 %1868  ;;  %v2125_v62 = vor.u32 1.1754944e-38, %v2124_v50  ;;  %vm2123_vm1 = vcmp.eq.f32.partialorder %v2122_v54, 8.507059e+37 }
 0x366   : > { %v2101_v39 = vmul.f32 %v2981_v27, %v2100_v36  ;;  %v1895_v33 = vadd.f32 %v3690_v6, %v1869_v38 }
 0x368   : > { %v2983_v41 = vpop.eup %2982  ;;  %v2102_v42 = vadd.f32 %v2981_v27, %v2101_v39  ;;  %v2763_v57 = vmul.f32 -1.442695, %v1895_v33 }
 0x369   : > { %v2985_v43 = vpop.eup %2984  ;;  %v1958_v45 = vadd.f32 1.0, %v2983_v41 }
 0x36a   : > { %v2106_v46 = vsel %vm2105_vm12, %v2981_v27, %v2102_v42  ;;  %v2114_v47 = vmul.f32 %v2985_v43, %v1957_v51  ;;  %2986 = vpow2.f32 %v2763_v57  ;;  %vm2119_vm14 = vweird.f32 %v2985_v43 }
 0x36b   : > { %v2111_v48 = vsel %vm2108_vm13, %v2110_v44, %v2106_v46  ;;  %2988 = vrcp.f32 %v1958_v45  ;;  %vm2120_vm0 = vmor %vm2118_vm15, %vm2119_vm14  ;;  %v2139_v30 = vand.u32 2147483648, %v1958_v45  ;;  %v2137_v5 = vand.u32 2147483647, %v1958_v45 }
 0x36c   : > { %2213 = vst.msk [vmem:[%s3700_s19 + $0x48] sm:$0xff] %vm2203_vm5, %v2111_v48  ;;  %v2115_v49 = vsub.f32 1.0, %v2114_v47  ;;  %vm2133_vm3 = vweird.f32 %v1958_v45 }
 0x36d   : > { %v1872_v52 = vpop.xlane.xlu1 %1871  ;;  %v2140_v10 = vor.u32 1.1754944e-38, %v2139_v30  ;;  %vm2138_vm6 = vcmp.eq.f32.partialorder %v2137_v5, 8.507059e+37 }
 0x36e   : > { %v2116_v53 = vmul.f32 %v2985_v43, %v2115_v49  ;;  %v1896_v56 = vadd.f32 %v3690_v6, %v1872_v52 }
 0x370   : > { %v2987_v59 = vpop.eup %2986  ;;  %v2117_v60 = vadd.f32 %v2985_v43, %v2116_v53  ;;  %v2764_v15 = vmul.f32 -1.442695, %v1896_v56 }
 0x371   : > { %v2989_v3 = vpop.eup %2988  ;;  %v1959_v63 = vadd.f32 1.0, %v2987_v59 }
 0x372   : > { %v2121_v0 = vsel %vm2120_vm0, %v2985_v43, %v2117_v60  ;;  %v2129_v17 = vmul.f32 %v2989_v3, %v1958_v45  ;;  %2990 = vpow2.f32 %v2764_v15  ;;  %vm2134_vm2 = vweird.f32 %v2989_v3 }
 0x373   : > { %v2126_v24 = vsel %vm2123_vm1, %v2125_v62, %v2121_v0  ;;  %2992 = vrcp.f32 %v1959_v63  ;;  %vm2135_vm4 = vmor %vm2133_vm3, %vm2134_vm2  ;;  %v2154_v19 = vand.u32 2147483648, %v1959_v63  ;;  %v2152_v55 = vand.u32 2147483647, %v1959_v63 }
 0x374   : > { %2214 = vst.msk [vmem:[%s3700_s19 + $0x50] sm:$0xff] %vm2203_vm5, %v2126_v24  ;;  %v2130_v1 = vsub.f32 1.0, %v2129_v17  ;;  %vm2148_vm8 = vweird.f32 %v1959_v63 }
 0x375   : > { %v1875_v2 = vpop.xlane.xlu2 %1874  ;;  %v2155_v25 = vor.u32 1.1754944e-38, %v2154_v19  ;;  %vm2153_vm10 = vcmp.eq.f32.partialorder %v2152_v55, 8.507059e+37 }
 0x376   : > { %v2131_v4 = vmul.f32 %v2989_v3, %v2130_v1  ;;  %v1897_v7 = vadd.f32 %v3690_v6, %v1875_v2 }
 0x378   : > { %v2991_v8 = vpop.eup %2990  ;;  %v2132_v28 = vadd.f32 %v2989_v3, %v2131_v4  ;;  %v2765_v29 = vmul.f32 -1.442695, %v1897_v7 }
 0x379   : > { %v2993_v9 = vpop.eup %2992  ;;  %v1960_v12 = vadd.f32 1.0, %v2991_v8 }
 0x37a   : > { %v2136_v13 = vsel %vm2135_vm4, %v2989_v3, %v2132_v28  ;;  %v2144_v14 = vmul.f32 %v2993_v9, %v1959_v63  ;;  %2994 = vpow2.f32 %v2765_v29  ;;  %vm2149_vm7 = vweird.f32 %v2993_v9 }
 0x37b   : > { %v2141_v16 = vsel %vm2138_vm6, %v2140_v10, %v2136_v13  ;;  %2996 = vrcp.f32 %v1960_v12  ;;  %vm2150_vm9 = vmor %vm2148_vm8, %vm2149_vm7  ;;  %v2169_v34 = vand.u32 2147483648, %v1960_v12  ;;  %v2167_v35 = vand.u32 2147483647, %v1960_v12 }
 0x37c   : > { %2215 = vst.msk [vmem:[%s3700_s19 + $0x58] sm:$0xff] %vm2203_vm5, %v2141_v16  ;;  %v2145_v18 = vsub.f32 1.0, %v2144_v14  ;;  %vm2163_vm12 = vweird.f32 %v1960_v12 }
 0x37d   : > { %v1878_v58 = vpop.xlane.xlu0 %1877  ;;  %v2170_v39 = vor.u32 1.1754944e-38, %v2169_v34  ;;  %vm2168_vm14 = vcmp.eq.f32.partialorder %v2167_v35, 8.507059e+37 }
 0x37e   : > { %v2146_v20 = vmul.f32 %v2993_v9, %v2145_v18  ;;  %v1898_v21 = vadd.f32 %v3690_v6, %v1878_v58 }
 0x380   : > { %v2995_v61 = vpop.eup %2994  ;;  %v2147_v22 = vadd.f32 %v2993_v9, %v2146_v20  ;;  %v2766_v11 = vmul.f32 -1.442695, %v1898_v21 }
 0x381   : > { %v2997_v23 = vpop.eup %2996  ;;  %v1961_v26 = vadd.f32 1.0, %v2995_v61 }
 0x382   : > { %v2151_v27 = vsel %vm2150_vm9, %v2993_v9, %v2147_v22  ;;  %v2159_v31 = vmul.f32 %v2997_v23, %v1960_v12  ;;  %2998 = vpow2.f32 %v2766_v11  ;;  %vm2164_vm11 = vweird.f32 %v2997_v23 }
 0x383   : > { %v2156_v51 = vsel %vm2153_vm10, %v2155_v25, %v2151_v27  ;;  %3000 = vrcp.f32 %v1961_v26  ;;  %vm2165_vm13 = vmor %vm2163_vm12, %vm2164_vm11  ;;  %v2184_v43 = vand.u32 2147483648, %v1961_v26  ;;  %v2182_v45 = vand.u32 2147483647, %v1961_v26 }
 0x384   : > { %2216 = vst.msk [vmem:[%s3700_s19 + $0x60] sm:$0xff] %vm2203_vm5, %v2156_v51  ;;  %v2160_v32 = vsub.f32 1.0, %v2159_v31  ;;  %vm2178_vm0 = vweird.f32 %v1961_v26 }
 0x385   : > { %v2185_v48 = vor.u32 1.1754944e-38, %v2184_v43  ;;  %vm2183_vm2 = vcmp.eq.f32.partialorder %v2182_v45, 8.507059e+37 }
 0x386   : > { %v2161_v6 = vmul.f32 %v2997_v23, %v2160_v32 }
 0x388   : > { %v2999_v36 = vpop.eup %2998  ;;  %v2162_v37 = vadd.f32 %v2997_v23, %v2161_v6 }
 0x389   : > { %v3001_v38 = vpop.eup %3000  ;;  %v1962_v40 = vadd.f32 1.0, %v2999_v36 }
 0x38a   : > { %v2166_v33 = vsel %vm2165_vm13, %v2997_v23, %v2162_v37  ;;  %v2174_v41 = vmul.f32 %v3001_v38, %v1961_v26  ;;  %vm2179_vm15 = vweird.f32 %v3001_v38 }
 0x38b   : > { %v2171_v42 = vsel %vm2168_vm14, %v2170_v39, %v2166_v33  ;;  %3002 = vrcp.f32 %v1962_v40  ;;  %vm2180_vm1 = vmor %vm2178_vm0, %vm2179_vm15  ;;  %v2199_v54 = vand.u32 2147483648, %v1962_v40  ;;  %v2197_v59 = vand.u32 2147483647, %v1962_v40 }
 0x38c   : > { %2217 = vst.msk [vmem:[%s3700_s19 + $0x68] sm:$0xff] %vm2203_vm5, %v2171_v42  ;;  %v2175_v57 = vsub.f32 1.0, %v2174_v41  ;;  %vm2193_vm4 = vweird.f32 %v1962_v40 }
 0x38d   : > { %v2200_v15 = vor.u32 1.1754944e-38, %v2199_v54  ;;  %vm2198_vm7 = vcmp.eq.f32.partialorder %v2197_v59, 8.507059e+37 }
 0x38e   : > { %v2176_v44 = vmul.f32 %v3001_v38, %v2175_v57 }
 0x390   : > { %v2177_v46 = vadd.f32 %v3001_v38, %v2176_v44 }
 0x391   : > { %v3003_v47 = vpop.eup %3002 }
 0x392   : > { %v2181_v49 = vsel %vm2180_vm1, %v3001_v38, %v2177_v46  ;;  %v2189_v50 = vmul.f32 %v3003_v47, %v1962_v40  ;;  %vm2194_vm3 = vweird.f32 %v3003_v47 }
 0x393   : > { %v2186_v52 = vsel %vm2183_vm2, %v2185_v48, %v2181_v49  ;;  %vm2195_vm6 = vmor %vm2193_vm4, %vm2194_vm3 }
 0x394   : > { %2218 = vst.msk [vmem:[%s3700_s19 + $0x70] sm:$0xff] %vm2203_vm5, %v2186_v52  ;;  %v2190_v53 = vsub.f32 1.0, %v2189_v50 }
 0x396   : > { %v2191_v56 = vmul.f32 %v3003_v47, %v2190_v53 }
 0x398   : > { %v2192_v60 = vadd.f32 %v3003_v47, %v2191_v56  ;;  %2226 = sbr.rel (!%p3180_p4) target bundleno = 973 (0x3cd), region = 68 }
 0x39a   : > { %v2196_v3 = vsel %vm2195_vm6, %v3003_v47, %v2192_v60 }
 0x39b   : > { %v2201_v62 = vsel %vm2198_vm7, %v2200_v15, %v2196_v3 }
 0x39c   : > { %2219 = vst.msk [vmem:[%s3700_s19 + $0x78] sm:$0xff] %vm2203_vm5, %v2201_v62 }
 0x39d   : > { %s3872_s15 = smov (!%p2229_p8, %s2228_s15), 16 }
 0x39e   : > { %s2769_s24 = sshll.u32 %s3872_s15, 3 }
 0x39f   : > { %p2772_p9 = scmp.eq.s32.totalorder %s2769_s24, 0 }
 0x3a0   : > { %s3759_s27 = sshrl.u32 (!%p2772_p9), %s3872_s15, 4 }
 0x3a1   : > { %2237 = sbr.rel (%p2772_p9) target bundleno = 973 (0x3cd), region = 72  ;;  %p2773_p10 = scmp.le.s32.totalorder (!%p2772_p9), %s3759_s27, 0 }
 0x3a6   : > { %2452 = sbr.rel (%p2773_p10) target bundleno = 956 (0x3bc), region = 148  ;;  %s3863_s10 = smov (!%p2773_p10), %s3753_s23 }
 0x3a7   : > { %s3864_s26 = smov (!%p2773_p10), %s3700_s19  ;;  %s3768_s16 = smov (!%p2773_p10), 0  }
 0x3a8   : > { %s3770_s28 = smov (!%p2773_p10), 0  }
 0x3ab LB: >> { %v2330_v63 = vld [vmem:[%s3066_s26] sm:$0xff]  ;;  %v2332_v0 = vld [vmem:[%s3066_s26 + $0x8] sm:$0xff]  ;;  %v2334_v17 = vld [vmem:[%s3066_s26 + $0x10] sm:$0xff]  ;;  %s2362_s29 = sadd.s32 1, %s3070_s16  ;;  %s2324_s28 = sadd.s32 1, %s3074_s28   ;;  %s3074_s28 = sphi %s3770_s28, %s2324_s28   ;;  %s3070_s16 = sphi %s3768_s16, %s3867_s16   ;;  %s3066_s26 = sphi %s3864_s26, %s3866_s26   ;;  %s3062_s10 = sphi %s3863_s10, %s3865_s10  }
 0x3ac   : >> { %2331 = vst [vmem:[%s3062_s10] sm:$0xff] %v2330_v63  ;;  %v2336_v24 = vld [vmem:[%s3066_s26 + $0x18] sm:$0xff]  ;;  %p2363_p11 = scmp.ge.s32.totalorder %s2362_s29, %s3759_s27  ;;  %v2338_v1 = vld [vmem:[%s3066_s26 + $0x20] sm:$0xff]  ;;  %v2340_v30 = vld [vmem:[%s3066_s26 + $0x28] sm:$0xff]  ;;  %p2323_p12 = scmp.ge.s32.totalorder %s2324_s28, %s3759_s27 }
 0x3ad   : >> { %2333 = vst [vmem:[%s3062_s10 + $0x8] sm:$0xff] %v2332_v0  ;;  %v2342_v2 = vld [vmem:[%s3066_s26 + $0x30] sm:$0xff]  ;;  %v2344_v4 = vld [vmem:[%s3066_s26 + $0x38] sm:$0xff]  ;;  %v2346_v5 = vld [vmem:[%s3066_s26 + $0x40] sm:$0xff] }
 0x3ae   : >> { %2335 = vst [vmem:[%s3062_s10 + $0x10] sm:$0xff] %v2334_v17  ;;  %s3874_s29 = smov (%p2363_p11, %s2362_s29), 0  ;;  %v2348_v7 = vld [vmem:[%s3066_s26 + $0x48] sm:$0xff]  ;;  %v2350_v8 = vld [vmem:[%s3066_s26 + $0x50] sm:$0xff]  ;;  %v2352_v28 = vld [vmem:[%s3066_s26 + $0x58] sm:$0xff] }
 0x3af   : >> { %2337 = vst [vmem:[%s3062_s10 + $0x18] sm:$0xff] %v2336_v24  ;;  %s2774_s30 = sshll.u32 %s3874_s29, 7  ;;  %v2354_v29 = vld [vmem:[%s3066_s26 + $0x60] sm:$0xff]  ;;  %v2356_v9 = vld [vmem:[%s3066_s26 + $0x68] sm:$0xff]  ;;  %v2358_v10 = vld [vmem:[%s3066_s26 + $0x70] sm:$0xff]  ;;  %s3867_s16 = smov %s3874_s29 }
 0x3b0   : >> { %2339 = vst [vmem:[%s3062_s10 + $0x20] sm:$0xff] %v2338_v1  ;;  %s2367_s12 = scalar_lea.vmem %s3700_s19, %s2774_s30 [#allocation3]   ;;  %s2368_s13 = scalar_lea.vmem %s3753_s23, %s2774_s30   ;;  %v2360_v12 = vld [vmem:[%s3066_s26 + $0x78] sm:$0xff] }
 0x3b1   : >> { %2341 = vst [vmem:[%s3062_s10 + $0x28] sm:$0xff] %v2340_v30  ;;  %s3866_s26 = smov %s2367_s12 }
 0x3b2   : >> { %2343 = vst [vmem:[%s3062_s10 + $0x30] sm:$0xff] %v2342_v2 }
 0x3b3   : >> { %2345 = vst [vmem:[%s3062_s10 + $0x38] sm:$0xff] %v2344_v4 }
 0x3b4   : >> { %2347 = vst [vmem:[%s3062_s10 + $0x40] sm:$0xff] %v2346_v5 }
 0x3b5   : >> { %2349 = vst [vmem:[%s3062_s10 + $0x48] sm:$0xff] %v2348_v7 }
 0x3b6   : >> { %2351 = vst [vmem:[%s3062_s10 + $0x50] sm:$0xff] %v2350_v8 }
 0x3b7   : >> { %2353 = vst [vmem:[%s3062_s10 + $0x58] sm:$0xff] %v2352_v28  ;;  %2326 = sbr.rel (!%p2323_p12) target bundleno = 939 (0x3ab), region = 154 }
 0x3b8   : >> { %2355 = vst [vmem:[%s3062_s10 + $0x60] sm:$0xff] %v2354_v29 }
 0x3b9   : >> { %2357 = vst [vmem:[%s3062_s10 + $0x68] sm:$0xff] %v2356_v9 }
 0x3ba   : >> { %2359 = vst [vmem:[%s3062_s10 + $0x70] sm:$0xff] %v2358_v10 }
 0x3bb   : >> { %2361 = vst [vmem:[%s3062_s10 + $0x78] sm:$0xff] %v2360_v12  ;;  %s3865_s10 = smov %s2368_s13 }
 0x3bc PF: > { %s3832_s14 = sand.u32 15, %s3872_s15   ;;  %s2841_s17 = sshll.u32 %s3759_s27, 7 }
 0x3bd   : > { %s2373_s18 = scalar_lea.vmem %s3700_s19, %s2841_s17 [#allocation3]   ;;  %s2375_s21 = scalar_lea.vmem %s3753_s23, %s2841_s17  }
 0x3be   : > { %p2779_p13 = scmp.le.s32.totalorder %s3832_s14, 0 }
 0x3bf   : > { %s3076_s24 = smov (!%p2779_p13), %s2375_s21   ;;  %s3080_s30 = smov (!%p2779_p13), %s2373_s18  }
 0x3c0   : > { %2466 = sbr.rel (%p2779_p13) target bundleno = 973 (0x3cd), region = 159  ;;  %s3084_s12 = smov (!%p2779_p13), 0  }
 0x3c1   : > { %s3088_s29 = smov (!%p2779_p13), 0  }
 0x3c5 LB: >> { %v2385_v13 = vld [vmem:[%s3082_s30] sm:$0xff]  ;;  %s2387_s15 = sadd.s32 1, %s3086_s12  ;;  %s2379_s29 = sadd.s32 1, %s3090_s29   ;;  %s3090_s29 = sphi %s3088_s29, %s2379_s29   ;;  %s3086_s12 = sphi %s3084_s12, %s3085_s12   ;;  %s3082_s30 = sphi %s3080_s30, %s2392_s30   ;;  %s3078_s24 = sphi %s3076_s24, %s2393_s24  }
 0x3c6   : >> { %2386 = vst [vmem:[%s3078_s24] sm:$0xff] %v2385_v13  ;;  %p2388_p0 = scmp.ge.s32.totalorder %s2387_s15, %s3832_s14  ;;  %p2378_p1 = scmp.ge.s32.totalorder %s2379_s29, %s3832_s14 }
 0x3c8   : >> { %s3876_s15 = smov (%p2388_p0, %s2387_s15), 0  ;;  %2381 = sbr.rel (!%p2378_p1) target bundleno = 965 (0x3c5), region = 165 }
 0x3c9   : >> { %s2780_s19 = sshll.u32 %s3876_s15, 3  ;;  %s3085_s12 = smov %s3876_s15  }
 0x3ca   : >> { %s2392_s30 = scalar_lea.vmem %s2373_s18, %s2780_s19 [#allocation3]   ;;  %s2393_s24 = scalar_lea.vmem %s2375_s21, %s2780_s19  }
 0x3cd PF: > { %p20_p2 = scmp.ge.s32.totalorder %s3170_s22, 4   ;;  %s3868_s19 = smov %s3054_s20 }
 0x3ce   : > { %s3869_s20 = smov %s3178_s25  ;;  %s3870_s21 = smov %s3170_s22 }
 0x3cf   :  { %22 = sbr.rel (!%p20_p2) target bundleno = 5 (0x5), region = 176 }

</bundles_post_ra>
